<compile_context>
chip_gen: v7x
topology: tpu7x:2x2x1
jax: 0.10.0
libtpu: 0.0.40
codegen_flags: <defaults>
</compile_context>

<pallas_src>
import jax
import jax.numpy as jnp
from jax import lax
from jax.experimental import pallas as pl
from jax.experimental.pallas import tpu as pltpu

EPS = 1e-5  # PyTorch LayerNorm default eps


def _film_kernel(x_ref, chem_ref, z_ref,
                 ln_w_ref, ln_b_ref,
                 w1_ref, b1_ref, w2_ref, b2_ref, cln_w_ref, cln_b_ref,
                 fw_xg_ref, fw_xb_ref, fw_zg_ref, fw_zb_ref,
                 fbg_ref, fbb_ref,
                 o_ref):
    x = x_ref[...].astype(jnp.float32)                       # (rows, D)

    # LayerNorm(x) over the feature (lane) axis, f32 math; reuse centered x.
    mu = jnp.mean(x, axis=-1, keepdims=True)
    xc = x - mu
    var = jnp.mean(xc * xc, axis=-1, keepdims=True)
    x_ln = xc * lax.rsqrt(var + EPS) * ln_w_ref[...] + ln_b_ref[...]

    chem = chem_ref[...].astype(jnp.float32)                  # (rows, 6)
    w1 = w1_ref[...]                                          # (3, 64)  f32
    w2 = w2_ref[...]                                          # (64, D)  matmul dtype

    def chem_proj(c3):
        # Linear(3,64): K=3 contraction as three VPU broadcast-FMAs (an MXU
        # pass at K=3 would waste >97% of the array).
        h = (c3[:, 0:1] * w1[0:1, :]
             + c3[:, 1:2] * w1[1:2, :]
             + c3[:, 2:3] * w1[2:3, :]
             + b1_ref[...])
        h = jnp.maximum(h, 0.0)                               # ReLU
        # Linear(64, D): MXU matmul, f32 accumulation.
        h = jnp.dot(h.astype(w2.dtype), w2,
                    preferred_element_type=jnp.float32) + b2_ref[...]
        hm = jnp.mean(h, axis=-1, keepdims=True)
        hc = h - hm
        hv = jnp.mean(hc * hc, axis=-1, keepdims=True)
        return hc * lax.rsqrt(hv + EPS) * cln_w_ref[...] + cln_b_ref[...]

    # z: per-batch context row (read once per tile) + seq_chem + rec_chem.
    z = (z_ref[...].astype(jnp.float32)
         + chem_proj(chem[:, 0:3]) + chem_proj(chem[:, 3:6]))

    # FiLM: concat([x_ln, z]) @ W + b with W pre-split (x/z rows, gamma/beta
    # columns) so gamma and beta come straight out of D-wide matmuls — no
    # lane-misaligned slice of a (rows, 2D) slab, half the live f32 slab.
    xm = x_ln.astype(fw_xg_ref.dtype)
    zm = z.astype(fw_zg_ref.dtype)
    gamma = (jnp.dot(xm, fw_xg_ref[...], preferred_element_type=jnp.float32)
             + jnp.dot(zm, fw_zg_ref[...], preferred_element_type=jnp.float32)
             + fbg_ref[...])
    beta = (jnp.dot(xm, fw_xb_ref[...], preferred_element_type=jnp.float32)
            + jnp.dot(zm, fw_zb_ref[...], preferred_element_type=jnp.float32)
            + fbb_ref[...])

    o_ref[...] = (gamma * x_ln + beta).astype(o_ref.dtype)


def film_with_concatenation(x, z, chemical_features, params, *,
                            row_tile=None, matmul_dtype=jnp.bfloat16):
    """x: (B,S,D), z: (B,D), chemical_features: (B,S,6) -> (B,S,D) in x.dtype.

    All LayerNorm / accumulation math is f32 in-kernel; pass bf16 x/z/chem to
    stream bf16 from HBM (output dtype follows x.dtype).
    """
    B, S, D = x.shape
    out_dtype = x.dtype
    mdt = matmul_dtype

    # Per-core VMEM: 128 MiB on v5e/v6e, 64 MiB on v7x; conservative fallback.
    try:
        vmem_cap = int(pltpu.get_tpu_info().vmem_capacity_bytes)
    except Exception:
        vmem_cap = 64 * 1024 * 1024

    # Chip-aware row tile: bigger tiles on 128-MiB parts (HBM-bound regime),
    # 256 on 64-MiB parts to keep headroom and feed both v7x TensorCores.
    if row_tile is None:
        row_tile = 256 if vmem_cap <= 64 * 1024 * 1024 else 512
    rt = S if S <= row_tile else max(8, (row_tile // 8) * 8)
    num_s_tiles = pl.cdiv(S, rt)   # tail tile (if any) is masked by Pallas

    z3 = z[:, None, :]             # (B, 1, D)

    # FiLM Linear stored (in, out) = (2D, 2D): split into x/z input halves and
    # gamma/beta output halves (one-time host-side slices).
    fw, fb = params["film_w"], params["film_b"]
    weight_list = [
        params["ln_w"][None, :], params["ln_b"][None, :],
        params["cp_w1"], params["cp_b1"][None, :],
        params["cp_w2"].astype(mdt), params["cp_b2"][None, :],
        params["cp_ln_w"][None, :], params["cp_ln_b"][None, :],
        fw[:D, :D].astype(mdt), fw[:D, D:].astype(mdt),   # x  -> gamma / beta
        fw[D:, :D].astype(mdt), fw[D:, D:].astype(mdt),   # z  -> gamma / beta
        fb[None, :D], fb[None, D:],
    ]

    # VMEM budget: streamed blocks double-buffered, weights (ideally) single-
    # buffered, plus slack for compiler-materialized f32 intermediates.
    stream_bytes = 2 * (rt * D * x.dtype.itemsize
                        + rt * 6 * chemical_features.dtype.itemsize
                        + rt * D * jnp.dtype(out_dtype).itemsize
                        + D * z.dtype.itemsize)
    weight_bytes = sum(int(w.size) * w.dtype.itemsize for w in weight_list)
    scratch_bytes = 10 * rt * D * 4   # x, x_ln, chem h, z, gamma, beta + slack
    vmem_needed = stream_bytes + 2 * weight_bytes + scratch_bytes
    vmem_limit = int(min(max(2 * vmem_needed, 16 * 1024 * 1024),
                         int(0.75 * vmem_cap)))

    x_spec = pl.BlockSpec((None, rt, D), lambda b, s: (b, s, 0))
    chem_spec = pl.BlockSpec((None, rt, 6), lambda b, s: (b, s, 0))
    z_spec = pl.BlockSpec((None, 1, D), lambda b, s: (b, 0, 0))
    out_spec = pl.BlockSpec((None, rt, D), lambda b, s: (b, s, 0))
    # NOTE: for deployed D < 128 the output stores are masked (vst.msk); fold
    # rows into lanes upstream if that ever shows up as the store bottleneck.

    def run(single_buffer_weights):
        if single_buffer_weights:
            def const_spec(arr):
                return pl.BlockSpec(arr.shape, lambda *_: (0,) * arr.ndim,
                                    pipeline_mode=pl.Buffered(1))
        else:
            def const_spec(arr):
                return pl.BlockSpec(arr.shape, lambda *_: (0,) * arr.ndim)

        call = pl.pallas_call(
            _film_kernel,
            out_shape=jax.ShapeDtypeStruct((B, S, D), out_dtype),
            grid=(B, num_s_tiles),
            in_specs=[x_spec, chem_spec, z_spec]
                     + [const_spec(w) for w in weight_list],
            out_specs=out_spec,
            compiler_params=pltpu.CompilerParams(
                dimension_semantics=("parallel", "parallel"),
                vmem_limit_bytes=vmem_limit),
        )
        return call(x, chemical_features, z3, *weight_list)

    try:
        # Grid-invariant operands single-buffered (halves weight VMEM).
        return run(True)
    except Exception:
        # Fallback for JAX builds without BlockSpec(pipeline_mode=Buffered(1)).
        return run(False)


def make_params(key, feature_dim):
    """Deterministic synthetic parameters (weights stored as (in, out))."""
    ks = jax.random.split(key, 6)
    scale = 0.1
    return {
        # layer_norm on x
        "ln_w": jnp.ones((feature_dim,), jnp.float32),
        "ln_b": jnp.zeros((feature_dim,), jnp.float32),
        # chemical_proj: Linear(3,64) -> ReLU -> Linear(64,D) -> LayerNorm(D)
        "cp_w1": scale * jax.random.normal(ks[0], (3, 64), jnp.float32),
        "cp_b1": scale * jax.random.normal(ks[1], (64,), jnp.float32),
        "cp_w2": scale * jax.random.normal(ks[2], (64, feature_dim), jnp.float32),
        "cp_b2": scale * jax.random.normal(ks[3], (feature_dim,), jnp.float32),
        "cp_ln_w": jnp.ones((feature_dim,), jnp.float32),
        "cp_ln_b": jnp.zeros((feature_dim,), jnp.float32),
        # film_layer: Linear(2D, 2D)
        "film_w": scale * jax.random.normal(ks[4], (2 * feature_dim, 2 * feature_dim), jnp.float32),
        "film_b": scale * jax.random.normal(ks[5], (2 * feature_dim,), jnp.float32),
    }


def reference(x, z, chem, params):
    """Pure-JAX reference mirroring the PyTorch forward (eval mode)."""
    def ln(v, w, b):
        m = jnp.mean(v, -1, keepdims=True)
        var = jnp.mean((v - m) ** 2, -1, keepdims=True)
        return (v - m) / jnp.sqrt(var + EPS) * w + b

    B, S, D = x.shape
    x_ln = ln(x, params["ln_w"], params["ln_b"])

    def chem_proj(c):
        h = jnp.maximum(c @ params["cp_w1"] + params["cp_b1"], 0.0)
        h = h @ params["cp_w2"] + params["cp_b2"]
        return ln(h, params["cp_ln_w"], params["cp_ln_b"])

    zz = jnp.broadcast_to(z[:, None, :], (B, S, D))
    zz = zz + chem_proj(chem[..., :3]) + chem_proj(chem[..., 3:])
    combined = jnp.concatenate([x_ln, zz], axis=-1)
    gb = combined @ params["film_w"] + params["film_b"]
    gamma, beta = gb[..., :D], gb[..., D:]
    return gamma * x_ln + beta


if __name__ == "__main__":
    B, S, D = 2, 8, 32
    key = jax.random.PRNGKey(0)
    kx, kz, kc, kp, kx2, kc2 = jax.random.split(key, 6)

    x = jax.random.normal(kx, (B, S, D), jnp.float32)
    z = jax.random.normal(kz, (B, D), jnp.float32)
    chem = jax.random.normal(kc, (B, S, 6), jnp.float32)
    params = make_params(kp, D)

    ref = reference(x, z, chem, params)

    # f32 matmul path: tight check against the reference.
    out_f32 = jax.block_until_ready(
        film_with_concatenation(x, z, chem, params, matmul_dtype=jnp.float32))
    assert out_f32.shape == (B, S, D)
    assert jnp.allclose(out_f32, ref, atol=1e-4, rtol=1e-4), (
        f"f32 max abs err {jnp.max(jnp.abs(out_f32 - ref))}")

    # Default bf16-operand matmuls (f32 accumulation): relaxed tolerance.
    out_bf16w = jax.block_until_ready(film_with_concatenation(x, z, chem, params))
    assert out_bf16w.shape == (B, S, D)
    assert jnp.allclose(out_bf16w, ref, atol=5e-2, rtol=5e-2), (
        f"bf16-weight max abs err {jnp.max(jnp.abs(out_bf16w - ref))}")

    # bf16 HBM streaming I/O (math still f32 in-kernel): smoke + loose check.
    out_bf16io = jax.block_until_ready(film_with_concatenation(
        x.astype(jnp.bfloat16), z.astype(jnp.bfloat16),
        chem.astype(jnp.bfloat16), params))
    assert out_bf16io.dtype == jnp.bfloat16
    assert jnp.allclose(out_bf16io.astype(jnp.float32), ref,
                        atol=1.5e-1, rtol=1.5e-1), (
        f"bf16-io max abs err {jnp.max(jnp.abs(out_bf16io.astype(jnp.float32) - ref))}")

    # Partial tail tile (S % row_tile != 0): exercises the no-pad masked path.
    S2 = 13
    x2 = jax.random.normal(kx2, (B, S2, D), jnp.float32)
    chem2 = jax.random.normal(kc2, (B, S2, 6), jnp.float32)
    ref2 = reference(x2, z, chem2, params)
    out2 = jax.block_until_ready(film_with_concatenation(
        x2, z, chem2, params, row_tile=8, matmul_dtype=jnp.float32))
    assert out2.shape == (B, S2, D)
    assert jnp.allclose(out2, ref2, atol=1e-4, rtol=1e-4), (
        f"tail-tile max abs err {jnp.max(jnp.abs(out2 - ref2))}")

    print("KERNEL_OK")
</pallas_src>

<mosaic_0001>
module attributes {stable_mosaic.version = 11 : i64} {
  func.func @_film_kernel(%arg0: i32, %arg1: i32, %arg2: memref<1x8x32xf32, #tpu.memory_space<vmem>>, %arg3: memref<1x8x6xf32, #tpu.memory_space<vmem>>, %arg4: memref<1x1x32xf32, #tpu.memory_space<vmem>>, %arg5: memref<1x32xf32, #tpu.memory_space<vmem>>, %arg6: memref<1x32xf32, #tpu.memory_space<vmem>>, %arg7: memref<3x64xf32, #tpu.memory_space<vmem>>, %arg8: memref<1x64xf32, #tpu.memory_space<vmem>>, %arg9: memref<64x32xf32, #tpu.memory_space<vmem>>, %arg10: memref<1x32xf32, #tpu.memory_space<vmem>>, %arg11: memref<1x32xf32, #tpu.memory_space<vmem>>, %arg12: memref<1x32xf32, #tpu.memory_space<vmem>>, %arg13: memref<32x32xf32, #tpu.memory_space<vmem>>, %arg14: memref<32x32xf32, #tpu.memory_space<vmem>>, %arg15: memref<32x32xf32, #tpu.memory_space<vmem>>, %arg16: memref<32x32xf32, #tpu.memory_space<vmem>>, %arg17: memref<1x32xf32, #tpu.memory_space<vmem>>, %arg18: memref<1x32xf32, #tpu.memory_space<vmem>>, %arg19: memref<1x8x32xf32, #tpu.memory_space<vmem>>) attributes {dimension_semantics = [#tpu.dimension_semantics<parallel>, #tpu.dimension_semantics<parallel>], iteration_bounds = array<i64: 2, 1>, scalar_prefetch = 0 : i64, scratch_operands = 0 : i64, tpu.core_type = #tpu.core_type<tc>, window_params = [{transform_indices = @transform_0, window_bounds = array<i64: 1, 8, 32>}, {transform_indices = @transform_1, window_bounds = array<i64: 1, 8, 6>}, {transform_indices = @transform_2, window_bounds = array<i64: 1, 1, 32>}, {pipeline_mode = #tpu.pipeline_mode<synchronous>, transform_indices = @transform_3, window_bounds = array<i64: 1, 32>}, {pipeline_mode = #tpu.pipeline_mode<synchronous>, transform_indices = @transform_4, window_bounds = array<i64: 1, 32>}, {pipeline_mode = #tpu.pipeline_mode<synchronous>, transform_indices = @transform_5, window_bounds = array<i64: 3, 64>}, {pipeline_mode = #tpu.pipeline_mode<synchronous>, transform_indices = @transform_6, window_bounds = array<i64: 1, 64>}, {pipeline_mode = #tpu.pipeline_mode<synchronous>, transform_indices = @transform_7, window_bounds = array<i64: 64, 32>}, {pipeline_mode = #tpu.pipeline_mode<synchronous>, transform_indices = @transform_8, window_bounds = array<i64: 1, 32>}, {pipeline_mode = #tpu.pipeline_mode<synchronous>, transform_indices = @transform_9, window_bounds = array<i64: 1, 32>}, {pipeline_mode = #tpu.pipeline_mode<synchronous>, transform_indices = @transform_10, window_bounds = array<i64: 1, 32>}, {pipeline_mode = #tpu.pipeline_mode<synchronous>, transform_indices = @transform_11, window_bounds = array<i64: 32, 32>}, {pipeline_mode = #tpu.pipeline_mode<synchronous>, transform_indices = @transform_12, window_bounds = array<i64: 32, 32>}, {pipeline_mode = #tpu.pipeline_mode<synchronous>, transform_indices = @transform_13, window_bounds = array<i64: 32, 32>}, {pipeline_mode = #tpu.pipeline_mode<synchronous>, transform_indices = @transform_14, window_bounds = array<i64: 32, 32>}, {pipeline_mode = #tpu.pipeline_mode<synchronous>, transform_indices = @transform_15, window_bounds = array<i64: 1, 32>}, {pipeline_mode = #tpu.pipeline_mode<synchronous>, transform_indices = @transform_16, window_bounds = array<i64: 1, 32>}, {transform_indices = @transform_17, window_bounds = array<i64: 1, 8, 32>}]} {
    %c0 = arith.constant 0 : index
    %c0_0 = arith.constant 0 : index
    %c0_1 = arith.constant 0 : index
    %0 = vector.load %arg2[%c0, %c0_0, %c0_1] : memref<1x8x32xf32, #tpu.memory_space<vmem>>, vector<1x8x32xf32>
    %1 = vector.shape_cast %0 : vector<1x8x32xf32> to vector<8x32xf32>
    %cst = arith.constant dense<0.000000e+00> : vector<8xf32>
    %2 = vector.multi_reduction <add>, %1, %cst [1] : vector<8x32xf32> to vector<8xf32>
    %3 = vector.shape_cast %2 : vector<8xf32> to vector<8x1xf32>
    %cst_2 = arith.constant 3.200000e+01 : f32
    %4 = vector.broadcast %cst_2 : f32 to vector<8x1xf32>
    %5 = arith.divf %3, %4 : vector<8x1xf32>
    %6 = vector.broadcast %5 : vector<8x1xf32> to vector<8x32xf32>
    %7 = arith.subf %1, %6 : vector<8x32xf32>
    %8 = arith.mulf %7, %7 : vector<8x32xf32>
    %cst_3 = arith.constant dense<0.000000e+00> : vector<8xf32>
    %9 = vector.multi_reduction <add>, %8, %cst_3 [1] : vector<8x32xf32> to vector<8xf32>
    %10 = vector.shape_cast %9 : vector<8xf32> to vector<8x1xf32>
    %cst_4 = arith.constant 3.200000e+01 : f32
    %11 = vector.broadcast %cst_4 : f32 to vector<8x1xf32>
    %12 = arith.divf %10, %11 : vector<8x1xf32>
    %cst_5 = arith.constant 9.99999974E-6 : f32
    %13 = vector.broadcast %cst_5 : f32 to vector<8x1xf32>
    %14 = arith.addf %12, %13 : vector<8x1xf32>
    %15 = math.rsqrt %14 : vector<8x1xf32>
    %16 = vector.broadcast %15 : vector<8x1xf32> to vector<8x32xf32>
    %17 = arith.mulf %7, %16 : vector<8x32xf32>
    %c0_6 = arith.constant 0 : index
    %c0_7 = arith.constant 0 : index
    %18 = vector.load %arg5[%c0_6, %c0_7] : memref<1x32xf32, #tpu.memory_space<vmem>>, vector<1x32xf32>
    %19 = vector.broadcast %18 : vector<1x32xf32> to vector<8x32xf32>
    %20 = arith.mulf %17, %19 : vector<8x32xf32>
    %c0_8 = arith.constant 0 : index
    %c0_9 = arith.constant 0 : index
    %21 = vector.load %arg6[%c0_8, %c0_9] : memref<1x32xf32, #tpu.memory_space<vmem>>, vector<1x32xf32>
    %22 = vector.broadcast %21 : vector<1x32xf32> to vector<8x32xf32>
    %23 = arith.addf %20, %22 : vector<8x32xf32>
    %c0_10 = arith.constant 0 : index
    %c0_11 = arith.constant 0 : index
    %c0_12 = arith.constant 0 : index
    %24 = vector.load %arg3[%c0_10, %c0_11, %c0_12] : memref<1x8x6xf32, #tpu.memory_space<vmem>>, vector<1x8x6xf32>
    %25 = vector.shape_cast %24 : vector<1x8x6xf32> to vector<8x6xf32>
    %c0_13 = arith.constant 0 : index
    %c0_14 = arith.constant 0 : index
    %26 = vector.load %arg7[%c0_13, %c0_14] : memref<3x64xf32, #tpu.memory_space<vmem>>, vector<3x64xf32>
    %c0_15 = arith.constant 0 : index
    %c0_16 = arith.constant 0 : index
    %27 = vector.load %arg9[%c0_15, %c0_16] : memref<64x32xf32, #tpu.memory_space<vmem>>, vector<64x32xf32>
    %c0_17 = arith.constant 0 : index
    %c0_18 = arith.constant 0 : index
    %c0_19 = arith.constant 0 : index
    %28 = vector.load %arg4[%c0_17, %c0_18, %c0_19] : memref<1x1x32xf32, #tpu.memory_space<vmem>>, vector<1x1x32xf32>
    %29 = vector.shape_cast %28 : vector<1x1x32xf32> to vector<1x32xf32>
    %30 = vector.extract_strided_slice %25 {offsets = [0, 0], sizes = [8, 3], strides = [1, 1]} : vector<8x6xf32> to vector<8x3xf32>
    %31 = vector.extract_strided_slice %30 {offsets = [0, 0], sizes = [8, 1], strides = [1, 1]} : vector<8x3xf32> to vector<8x1xf32>
    %32 = vector.extract_strided_slice %26 {offsets = [0, 0], sizes = [1, 64], strides = [1, 1]} : vector<3x64xf32> to vector<1x64xf32>
    %33 = vector.broadcast %31 : vector<8x1xf32> to vector<8x64xf32>
    %34 = vector.broadcast %32 : vector<1x64xf32> to vector<8x64xf32>
    %35 = arith.mulf %33, %34 : vector<8x64xf32>
    %36 = vector.extract_strided_slice %30 {offsets = [0, 1], sizes = [8, 1], strides = [1, 1]} : vector<8x3xf32> to vector<8x1xf32>
    %37 = vector.extract_strided_slice %26 {offsets = [1, 0], sizes = [1, 64], strides = [1, 1]} : vector<3x64xf32> to vector<1x64xf32>
    %38 = vector.broadcast %36 : vector<8x1xf32> to vector<8x64xf32>
    %39 = vector.broadcast %37 : vector<1x64xf32> to vector<8x64xf32>
    %40 = arith.mulf %38, %39 : vector<8x64xf32>
    %41 = arith.addf %35, %40 : vector<8x64xf32>
    %42 = vector.extract_strided_slice %30 {offsets = [0, 2], sizes = [8, 1], strides = [1, 1]} : vector<8x3xf32> to vector<8x1xf32>
    %43 = vector.extract_strided_slice %26 {offsets = [2, 0], sizes = [1, 64], strides = [1, 1]} : vector<3x64xf32> to vector<1x64xf32>
    %44 = vector.broadcast %42 : vector<8x1xf32> to vector<8x64xf32>
    %45 = vector.broadcast %43 : vector<1x64xf32> to vector<8x64xf32>
    %46 = arith.mulf %44, %45 : vector<8x64xf32>
    %47 = arith.addf %41, %46 : vector<8x64xf32>
    %c0_20 = arith.constant 0 : index
    %c0_21 = arith.constant 0 : index
    %48 = vector.load %arg8[%c0_20, %c0_21] : memref<1x64xf32, #tpu.memory_space<vmem>>, vector<1x64xf32>
    %49 = vector.broadcast %48 : vector<1x64xf32> to vector<8x64xf32>
    %50 = arith.addf %47, %49 : vector<8x64xf32>
    %cst_22 = arith.constant 0.000000e+00 : f32
    %51 = vector.broadcast %cst_22 : f32 to vector<8x64xf32>
    %52 = arith.maximumf %50, %51 : vector<8x64xf32>
    %cst_23 = arith.constant dense<0.000000e+00> : vector<8x32xf32>
    %53 = tpu.matmul %52, %27, %cst_23 {dimension_numbers = #tpu.dot_dimension_numbers<[1], [0], [0], [1], [0, 0, 1, 1], [], []>} : vector<8x64xf32>, vector<64x32xf32>, vector<8x32xf32> -> vector<8x32xf32>
    %c0_24 = arith.constant 0 : index
    %c0_25 = arith.constant 0 : index
    %54 = vector.load %arg10[%c0_24, %c0_25] : memref<1x32xf32, #tpu.memory_space<vmem>>, vector<1x32xf32>
    %55 = vector.broadcast %54 : vector<1x32xf32> to vector<8x32xf32>
    %56 = arith.addf %53, %55 : vector<8x32xf32>
    %cst_26 = arith.constant dense<0.000000e+00> : vector<8xf32>
    %57 = vector.multi_reduction <add>, %56, %cst_26 [1] : vector<8x32xf32> to vector<8xf32>
    %58 = vector.shape_cast %57 : vector<8xf32> to vector<8x1xf32>
    %cst_27 = arith.constant 3.200000e+01 : f32
    %59 = vector.broadcast %cst_27 : f32 to vector<8x1xf32>
    %60 = arith.divf %58, %59 : vector<8x1xf32>
    %61 = vector.broadcast %60 : vector<8x1xf32> to vector<8x32xf32>
    %62 = arith.subf %56, %61 : vector<8x32xf32>
    %63 = arith.mulf %62, %62 : vector<8x32xf32>
    %cst_28 = arith.constant dense<0.000000e+00> : vector<8xf32>
    %64 = vector.multi_reduction <add>, %63, %cst_28 [1] : vector<8x32xf32> to vector<8xf32>
    %65 = vector.shape_cast %64 : vector<8xf32> to vector<8x1xf32>
    %cst_29 = arith.constant 3.200000e+01 : f32
    %66 = vector.broadcast %cst_29 : f32 to vector<8x1xf32>
    %67 = arith.divf %65, %66 : vector<8x1xf32>
    %cst_30 = arith.constant 9.99999974E-6 : f32
    %68 = vector.broadcast %cst_30 : f32 to vector<8x1xf32>
    %69 = arith.addf %67, %68 : vector<8x1xf32>
    %70 = math.rsqrt %69 : vector<8x1xf32>
    %71 = vector.broadcast %70 : vector<8x1xf32> to vector<8x32xf32>
    %72 = arith.mulf %62, %71 : vector<8x32xf32>
    %c0_31 = arith.constant 0 : index
    %c0_32 = arith.constant 0 : index
    %73 = vector.load %arg11[%c0_31, %c0_32] : memref<1x32xf32, #tpu.memory_space<vmem>>, vector<1x32xf32>
    %74 = vector.broadcast %73 : vector<1x32xf32> to vector<8x32xf32>
    %75 = arith.mulf %72, %74 : vector<8x32xf32>
    %c0_33 = arith.constant 0 : index
    %c0_34 = arith.constant 0 : index
    %76 = vector.load %arg12[%c0_33, %c0_34] : memref<1x32xf32, #tpu.memory_space<vmem>>, vector<1x32xf32>
    %77 = vector.broadcast %76 : vector<1x32xf32> to vector<8x32xf32>
    %78 = arith.addf %75, %77 : vector<8x32xf32>
    %79 = vector.broadcast %29 : vector<1x32xf32> to vector<8x32xf32>
    %80 = arith.addf %79, %78 : vector<8x32xf32>
    %81 = vector.extract_strided_slice %25 {offsets = [0, 3], sizes = [8, 3], strides = [1, 1]} : vector<8x6xf32> to vector<8x3xf32>
    %82 = vector.extract_strided_slice %81 {offsets = [0, 0], sizes = [8, 1], strides = [1, 1]} : vector<8x3xf32> to vector<8x1xf32>
    %83 = vector.extract_strided_slice %26 {offsets = [0, 0], sizes = [1, 64], strides = [1, 1]} : vector<3x64xf32> to vector<1x64xf32>
    %84 = vector.broadcast %82 : vector<8x1xf32> to vector<8x64xf32>
    %85 = vector.broadcast %83 : vector<1x64xf32> to vector<8x64xf32>
    %86 = arith.mulf %84, %85 : vector<8x64xf32>
    %87 = vector.extract_strided_slice %81 {offsets = [0, 1], sizes = [8, 1], strides = [1, 1]} : vector<8x3xf32> to vector<8x1xf32>
    %88 = vector.extract_strided_slice %26 {offsets = [1, 0], sizes = [1, 64], strides = [1, 1]} : vector<3x64xf32> to vector<1x64xf32>
    %89 = vector.broadcast %87 : vector<8x1xf32> to vector<8x64xf32>
    %90 = vector.broadcast %88 : vector<1x64xf32> to vector<8x64xf32>
    %91 = arith.mulf %89, %90 : vector<8x64xf32>
    %92 = arith.addf %86, %91 : vector<8x64xf32>
    %93 = vector.extract_strided_slice %81 {offsets = [0, 2], sizes = [8, 1], strides = [1, 1]} : vector<8x3xf32> to vector<8x1xf32>
    %94 = vector.extract_strided_slice %26 {offsets = [2, 0], sizes = [1, 64], strides = [1, 1]} : vector<3x64xf32> to vector<1x64xf32>
    %95 = vector.broadcast %93 : vector<8x1xf32> to vector<8x64xf32>
    %96 = vector.broadcast %94 : vector<1x64xf32> to vector<8x64xf32>
    %97 = arith.mulf %95, %96 : vector<8x64xf32>
    %98 = arith.addf %92, %97 : vector<8x64xf32>
    %c0_35 = arith.constant 0 : index
    %c0_36 = arith.constant 0 : index
    %99 = vector.load %arg8[%c0_35, %c0_36] : memref<1x64xf32, #tpu.memory_space<vmem>>, vector<1x64xf32>
    %100 = vector.broadcast %99 : vector<1x64xf32> to vector<8x64xf32>
    %101 = arith.addf %98, %100 : vector<8x64xf32>
    %cst_37 = arith.constant 0.000000e+00 : f32
    %102 = vector.broadcast %cst_37 : f32 to vector<8x64xf32>
    %103 = arith.maximumf %101, %102 : vector<8x64xf32>
    %cst_38 = arith.constant dense<0.000000e+00> : vector<8x32xf32>
    %104 = tpu.matmul %103, %27, %cst_38 {dimension_numbers = #tpu.dot_dimension_numbers<[1], [0], [0], [1], [0, 0, 1, 1], [], []>} : vector<8x64xf32>, vector<64x32xf32>, vector<8x32xf32> -> vector<8x32xf32>
    %c0_39 = arith.constant 0 : index
    %c0_40 = arith.constant 0 : index
    %105 = vector.load %arg10[%c0_39, %c0_40] : memref<1x32xf32, #tpu.memory_space<vmem>>, vector<1x32xf32>
    %106 = vector.broadcast %105 : vector<1x32xf32> to vector<8x32xf32>
    %107 = arith.addf %104, %106 : vector<8x32xf32>
    %cst_41 = arith.constant dense<0.000000e+00> : vector<8xf32>
    %108 = vector.multi_reduction <add>, %107, %cst_41 [1] : vector<8x32xf32> to vector<8xf32>
    %109 = vector.shape_cast %108 : vector<8xf32> to vector<8x1xf32>
    %cst_42 = arith.constant 3.200000e+01 : f32
    %110 = vector.broadcast %cst_42 : f32 to vector<8x1xf32>
    %111 = arith.divf %109, %110 : vector<8x1xf32>
    %112 = vector.broadcast %111 : vector<8x1xf32> to vector<8x32xf32>
    %113 = arith.subf %107, %112 : vector<8x32xf32>
    %114 = arith.mulf %113, %113 : vector<8x32xf32>
    %cst_43 = arith.constant dense<0.000000e+00> : vector<8xf32>
    %115 = vector.multi_reduction <add>, %114, %cst_43 [1] : vector<8x32xf32> to vector<8xf32>
    %116 = vector.shape_cast %115 : vector<8xf32> to vector<8x1xf32>
    %cst_44 = arith.constant 3.200000e+01 : f32
    %117 = vector.broadcast %cst_44 : f32 to vector<8x1xf32>
    %118 = arith.divf %116, %117 : vector<8x1xf32>
    %cst_45 = arith.constant 9.99999974E-6 : f32
    %119 = vector.broadcast %cst_45 : f32 to vector<8x1xf32>
    %120 = arith.addf %118, %119 : vector<8x1xf32>
    %121 = math.rsqrt %120 : vector<8x1xf32>
    %122 = vector.broadcast %121 : vector<8x1xf32> to vector<8x32xf32>
    %123 = arith.mulf %113, %122 : vector<8x32xf32>
    %c0_46 = arith.constant 0 : index
    %c0_47 = arith.constant 0 : index
    %124 = vector.load %arg11[%c0_46, %c0_47] : memref<1x32xf32, #tpu.memory_space<vmem>>, vector<1x32xf32>
    %125 = vector.broadcast %124 : vector<1x32xf32> to vector<8x32xf32>
    %126 = arith.mulf %123, %125 : vector<8x32xf32>
    %c0_48 = arith.constant 0 : index
    %c0_49 = arith.constant 0 : index
    %127 = vector.load %arg12[%c0_48, %c0_49] : memref<1x32xf32, #tpu.memory_space<vmem>>, vector<1x32xf32>
    %128 = vector.broadcast %127 : vector<1x32xf32> to vector<8x32xf32>
    %129 = arith.addf %126, %128 : vector<8x32xf32>
    %130 = arith.addf %80, %129 : vector<8x32xf32>
    %c0_50 = arith.constant 0 : index
    %c0_51 = arith.constant 0 : index
    %131 = vector.load %arg13[%c0_50, %c0_51] : memref<32x32xf32, #tpu.memory_space<vmem>>, vector<32x32xf32>
    %cst_52 = arith.constant dense<0.000000e+00> : vector<8x32xf32>
    %132 = tpu.matmul %23, %131, %cst_52 {dimension_numbers = #tpu.dot_dimension_numbers<[1], [0], [0], [1], [0, 0, 1, 1], [], []>} : vector<8x32xf32>, vector<32x32xf32>, vector<8x32xf32> -> vector<8x32xf32>
    %c0_53 = arith.constant 0 : index
    %c0_54 = arith.constant 0 : index
    %133 = vector.load %arg15[%c0_53, %c0_54] : memref<32x32xf32, #tpu.memory_space<vmem>>, vector<32x32xf32>
    %cst_55 = arith.constant dense<0.000000e+00> : vector<8x32xf32>
    %134 = tpu.matmul %130, %133, %cst_55 {dimension_numbers = #tpu.dot_dimension_numbers<[1], [0], [0], [1], [0, 0, 1, 1], [], []>} : vector<8x32xf32>, vector<32x32xf32>, vector<8x32xf32> -> vector<8x32xf32>
    %135 = arith.addf %132, %134 : vector<8x32xf32>
    %c0_56 = arith.constant 0 : index
    %c0_57 = arith.constant 0 : index
    %136 = vector.load %arg17[%c0_56, %c0_57] : memref<1x32xf32, #tpu.memory_space<vmem>>, vector<1x32xf32>
    %137 = vector.broadcast %136 : vector<1x32xf32> to vector<8x32xf32>
    %138 = arith.addf %135, %137 : vector<8x32xf32>
    %c0_58 = arith.constant 0 : index
    %c0_59 = arith.constant 0 : index
    %139 = vector.load %arg14[%c0_58, %c0_59] : memref<32x32xf32, #tpu.memory_space<vmem>>, vector<32x32xf32>
    %cst_60 = arith.constant dense<0.000000e+00> : vector<8x32xf32>
    %140 = tpu.matmul %23, %139, %cst_60 {dimension_numbers = #tpu.dot_dimension_numbers<[1], [0], [0], [1], [0, 0, 1, 1], [], []>} : vector<8x32xf32>, vector<32x32xf32>, vector<8x32xf32> -> vector<8x32xf32>
    %c0_61 = arith.constant 0 : index
    %c0_62 = arith.constant 0 : index
    %141 = vector.load %arg16[%c0_61, %c0_62] : memref<32x32xf32, #tpu.memory_space<vmem>>, vector<32x32xf32>
    %cst_63 = arith.constant dense<0.000000e+00> : vector<8x32xf32>
    %142 = tpu.matmul %130, %141, %cst_63 {dimension_numbers = #tpu.dot_dimension_numbers<[1], [0], [0], [1], [0, 0, 1, 1], [], []>} : vector<8x32xf32>, vector<32x32xf32>, vector<8x32xf32> -> vector<8x32xf32>
    %143 = arith.addf %140, %142 : vector<8x32xf32>
    %c0_64 = arith.constant 0 : index
    %c0_65 = arith.constant 0 : index
    %144 = vector.load %arg18[%c0_64, %c0_65] : memref<1x32xf32, #tpu.memory_space<vmem>>, vector<1x32xf32>
    %145 = vector.broadcast %144 : vector<1x32xf32> to vector<8x32xf32>
    %146 = arith.addf %143, %145 : vector<8x32xf32>
    %147 = arith.mulf %138, %23 : vector<8x32xf32>
    %148 = arith.addf %147, %146 : vector<8x32xf32>
    %c0_66 = arith.constant 0 : index
    %c0_67 = arith.constant 0 : index
    %c0_68 = arith.constant 0 : index
    %149 = vector.load %arg19[%c0_66, %c0_67, %c0_68] : memref<1x8x32xf32, #tpu.memory_space<vmem>>, vector<1x8x32xf32>
    %150 = vector.shape_cast %149 : vector<1x8x32xf32> to vector<8x32xf32>
    %151 = vector.shape_cast %148 : vector<8x32xf32> to vector<1x8x32xf32>
    tpu.vector_store %arg19[%c0_66, %c0_67, %c0_68], %151 {strides = array<i32>} : memref<1x8x32xf32, #tpu.memory_space<vmem>>, vector<1x8x32xf32>,
    return
  }
  func.func @transform_0(%arg0: i32, %arg1: i32) -> (i32, i32, i32) {
    %c0_i32 = arith.constant 0 : i32
    %c0_i32_0 = arith.constant 0 : i32
    return %arg0, %arg1, %c0_i32 : i32, i32, i32
  }
  func.func @transform_1(%arg0: i32, %arg1: i32) -> (i32, i32, i32) {
    %c0_i32 = arith.constant 0 : i32
    %c0_i32_0 = arith.constant 0 : i32
    return %arg0, %arg1, %c0_i32 : i32, i32, i32
  }
  func.func @transform_2(%arg0: i32, %arg1: i32) -> (i32, i32, i32) {
    %c0_i32 = arith.constant 0 : i32
    %c0_i32_0 = arith.constant 0 : i32
    %c0_i32_1 = arith.constant 0 : i32
    return %arg0, %c0_i32, %c0_i32_0 : i32, i32, i32
  }
  func.func @transform_3(%arg0: i32, %arg1: i32) -> (i32, i32) {
    %c0_i32 = arith.constant 0 : i32
    %c0_i32_0 = arith.constant 0 : i32
    %c0_i32_1 = arith.constant 0 : i32
    return %c0_i32, %c0_i32_0 : i32, i32
  }
  func.func @transform_4(%arg0: i32, %arg1: i32) -> (i32, i32) {
    %c0_i32 = arith.constant 0 : i32
    %c0_i32_0 = arith.constant 0 : i32
    %c0_i32_1 = arith.constant 0 : i32
    return %c0_i32, %c0_i32_0 : i32, i32
  }
  func.func @transform_5(%arg0: i32, %arg1: i32) -> (i32, i32) {
    %c0_i32 = arith.constant 0 : i32
    %c0_i32_0 = arith.constant 0 : i32
    %c0_i32_1 = arith.constant 0 : i32
    return %c0_i32, %c0_i32_0 : i32, i32
  }
  func.func @transform_6(%arg0: i32, %arg1: i32) -> (i32, i32) {
    %c0_i32 = arith.constant 0 : i32
    %c0_i32_0 = arith.constant 0 : i32
    %c0_i32_1 = arith.constant 0 : i32
    return %c0_i32, %c0_i32_0 : i32, i32
  }
  func.func @transform_7(%arg0: i32, %arg1: i32) -> (i32, i32) {
    %c0_i32 = arith.constant 0 : i32
    %c0_i32_0 = arith.constant 0 : i32
    %c0_i32_1 = arith.constant 0 : i32
    return %c0_i32, %c0_i32_0 : i32, i32
  }
  func.func @transform_8(%arg0: i32, %arg1: i32) -> (i32, i32) {
    %c0_i32 = arith.constant 0 : i32
    %c0_i32_0 = arith.constant 0 : i32
    %c0_i32_1 = arith.constant 0 : i32
    return %c0_i32, %c0_i32_0 : i32, i32
  }
  func.func @transform_9(%arg0: i32, %arg1: i32) -> (i32, i32) {
    %c0_i32 = arith.constant 0 : i32
    %c0_i32_0 = arith.constant 0 : i32
    %c0_i32_1 = arith.constant 0 : i32
    return %c0_i32, %c0_i32_0 : i32, i32
  }
  func.func @transform_10(%arg0: i32, %arg1: i32) -> (i32, i32) {
    %c0_i32 = arith.constant 0 : i32
    %c0_i32_0 = arith.constant 0 : i32
    %c0_i32_1 = arith.constant 0 : i32
    return %c0_i32, %c0_i32_0 : i32, i32
  }
  func.func @transform_11(%arg0: i32, %arg1: i32) -> (i32, i32) {
    %c0_i32 = arith.constant 0 : i32
    %c0_i32_0 = arith.constant 0 : i32
    %c0_i32_1 = arith.constant 0 : i32
    return %c0_i32, %c0_i32_0 : i32, i32
  }
  func.func @transform_12(%arg0: i32, %arg1: i32) -> (i32, i32) {
    %c0_i32 = arith.constant 0 : i32
    %c0_i32_0 = arith.constant 0 : i32
    %c0_i32_1 = arith.constant 0 : i32
    return %c0_i32, %c0_i32_0 : i32, i32
  }
  func.func @transform_13(%arg0: i32, %arg1: i32) -> (i32, i32) {
    %c0_i32 = arith.constant 0 : i32
    %c0_i32_0 = arith.constant 0 : i32
    %c0_i32_1 = arith.constant 0 : i32
    return %c0_i32, %c0_i32_0 : i32, i32
  }
  func.func @transform_14(%arg0: i32, %arg1: i32) -> (i32, i32) {
    %c0_i32 = arith.constant 0 : i32
    %c0_i32_0 = arith.constant 0 : i32
    %c0_i32_1 = arith.constant 0 : i32
    return %c0_i32, %c0_i32_0 : i32, i32
  }
  func.func @transform_15(%arg0: i32, %arg1: i32) -> (i32, i32) {
    %c0_i32 = arith.constant 0 : i32
    %c0_i32_0 = arith.constant 0 : i32
    %c0_i32_1 = arith.constant 0 : i32
    return %c0_i32, %c0_i32_0 : i32, i32
  }
  func.func @transform_16(%arg0: i32, %arg1: i32) -> (i32, i32) {
    %c0_i32 = arith.constant 0 : i32
    %c0_i32_0 = arith.constant 0 : i32
    %c0_i32_1 = arith.constant 0 : i32
    return %c0_i32, %c0_i32_0 : i32, i32
  }
  func.func @transform_17(%arg0: i32, %arg1: i32) -> (i32, i32, i32) {
    %c0_i32 = arith.constant 0 : i32
    %c0_i32_0 = arith.constant 0 : i32
    return %arg0, %arg1, %c0_i32 : i32, i32, i32
  }
}

module attributes {stable_mosaic.version = 11 : i64} {
  func.func @_film_kernel(%arg0: i32, %arg1: i32, %arg2: memref<1x8x32xf32, #tpu.memory_space<vmem>>, %arg3: memref<1x8x6xf32, #tpu.memory_space<vmem>>, %arg4: memref<1x1x32xf32, #tpu.memory_space<vmem>>, %arg5: memref<1x32xf32, #tpu.memory_space<vmem>>, %arg6: memref<1x32xf32, #tpu.memory_space<vmem>>, %arg7: memref<3x64xf32, #tpu.memory_space<vmem>>, %arg8: memref<1x64xf32, #tpu.memory_space<vmem>>, %arg9: memref<64x32xf32, #tpu.memory_space<vmem>>, %arg10: memref<1x32xf32, #tpu.memory_space<vmem>>, %arg11: memref<1x32xf32, #tpu.memory_space<vmem>>, %arg12: memref<1x32xf32, #tpu.memory_space<vmem>>, %arg13: memref<32x32xf32, #tpu.memory_space<vmem>>, %arg14: memref<32x32xf32, #tpu.memory_space<vmem>>, %arg15: memref<32x32xf32, #tpu.memory_space<vmem>>, %arg16: memref<32x32xf32, #tpu.memory_space<vmem>>, %arg17: memref<1x32xf32, #tpu.memory_space<vmem>>, %arg18: memref<1x32xf32, #tpu.memory_space<vmem>>, %arg19: memref<1x8x32xf32, #tpu.memory_space<vmem>>) attributes {dimension_semantics = [#tpu.dimension_semantics<parallel>, #tpu.dimension_semantics<parallel>], iteration_bounds = array<i64: 2, 1>, scalar_prefetch = 0 : i64, scratch_operands = 0 : i64, tpu.core_type = #tpu.core_type<tc>, window_params = [{transform_indices = @transform_0, window_bounds = array<i64: 1, 8, 32>}, {transform_indices = @transform_1, window_bounds = array<i64: 1, 8, 6>}, {transform_indices = @transform_2, window_bounds = array<i64: 1, 1, 32>}, {pipeline_mode = #tpu.pipeline_mode<synchronous>, transform_indices = @transform_3, window_bounds = array<i64: 1, 32>}, {pipeline_mode = #tpu.pipeline_mode<synchronous>, transform_indices = @transform_4, window_bounds = array<i64: 1, 32>}, {pipeline_mode = #tpu.pipeline_mode<synchronous>, transform_indices = @transform_5, window_bounds = array<i64: 3, 64>}, {pipeline_mode = #tpu.pipeline_mode<synchronous>, transform_indices = @transform_6, window_bounds = array<i64: 1, 64>}, {pipeline_mode = #tpu.pipeline_mode<synchronous>, transform_indices = @transform_7, window_bounds = array<i64: 64, 32>}, {pipeline_mode = #tpu.pipeline_mode<synchronous>, transform_indices = @transform_8, window_bounds = array<i64: 1, 32>}, {pipeline_mode = #tpu.pipeline_mode<synchronous>, transform_indices = @transform_9, window_bounds = array<i64: 1, 32>}, {pipeline_mode = #tpu.pipeline_mode<synchronous>, transform_indices = @transform_10, window_bounds = array<i64: 1, 32>}, {pipeline_mode = #tpu.pipeline_mode<synchronous>, transform_indices = @transform_11, window_bounds = array<i64: 32, 32>}, {pipeline_mode = #tpu.pipeline_mode<synchronous>, transform_indices = @transform_12, window_bounds = array<i64: 32, 32>}, {pipeline_mode = #tpu.pipeline_mode<synchronous>, transform_indices = @transform_13, window_bounds = array<i64: 32, 32>}, {pipeline_mode = #tpu.pipeline_mode<synchronous>, transform_indices = @transform_14, window_bounds = array<i64: 32, 32>}, {pipeline_mode = #tpu.pipeline_mode<synchronous>, transform_indices = @transform_15, window_bounds = array<i64: 1, 32>}, {pipeline_mode = #tpu.pipeline_mode<synchronous>, transform_indices = @transform_16, window_bounds = array<i64: 1, 32>}, {transform_indices = @transform_17, window_bounds = array<i64: 1, 8, 32>}]} {
    %c0 = arith.constant 0 : index
    %c0_0 = arith.constant 0 : index
    %c0_1 = arith.constant 0 : index
    %0 = vector.load %arg2[%c0, %c0_0, %c0_1] : memref<1x8x32xf32, #tpu.memory_space<vmem>>, vector<1x8x32xf32>
    %1 = vector.shape_cast %0 : vector<1x8x32xf32> to vector<8x32xf32>
    %cst = arith.constant dense<0.000000e+00> : vector<8xf32>
    %2 = vector.multi_reduction <add>, %1, %cst [1] : vector<8x32xf32> to vector<8xf32>
    %3 = vector.shape_cast %2 : vector<8xf32> to vector<8x1xf32>
    %cst_2 = arith.constant 3.200000e+01 : f32
    %4 = vector.broadcast %cst_2 : f32 to vector<8x1xf32>
    %5 = arith.divf %3, %4 : vector<8x1xf32>
    %6 = vector.broadcast %5 : vector<8x1xf32> to vector<8x32xf32>
    %7 = arith.subf %1, %6 : vector<8x32xf32>
    %8 = arith.mulf %7, %7 : vector<8x32xf32>
    %cst_3 = arith.constant dense<0.000000e+00> : vector<8xf32>
    %9 = vector.multi_reduction <add>, %8, %cst_3 [1] : vector<8x32xf32> to vector<8xf32>
    %10 = vector.shape_cast %9 : vector<8xf32> to vector<8x1xf32>
    %cst_4 = arith.constant 3.200000e+01 : f32
    %11 = vector.broadcast %cst_4 : f32 to vector<8x1xf32>
    %12 = arith.divf %10, %11 : vector<8x1xf32>
    %cst_5 = arith.constant 9.99999974E-6 : f32
    %13 = vector.broadcast %cst_5 : f32 to vector<8x1xf32>
    %14 = arith.addf %12, %13 : vector<8x1xf32>
    %15 = math.rsqrt %14 : vector<8x1xf32>
    %16 = vector.broadcast %15 : vector<8x1xf32> to vector<8x32xf32>
    %17 = arith.mulf %7, %16 : vector<8x32xf32>
    %c0_6 = arith.constant 0 : index
    %c0_7 = arith.constant 0 : index
    %18 = vector.load %arg5[%c0_6, %c0_7] : memref<1x32xf32, #tpu.memory_space<vmem>>, vector<1x32xf32>
    %19 = vector.broadcast %18 : vector<1x32xf32> to vector<8x32xf32>
    %20 = arith.mulf %17, %19 : vector<8x32xf32>
    %c0_8 = arith.constant 0 : index
    %c0_9 = arith.constant 0 : index
    %21 = vector.load %arg6[%c0_8, %c0_9] : memref<1x32xf32, #tpu.memory_space<vmem>>, vector<1x32xf32>
    %22 = vector.broadcast %21 : vector<1x32xf32> to vector<8x32xf32>
    %23 = arith.addf %20, %22 : vector<8x32xf32>
    %c0_10 = arith.constant 0 : index
    %c0_11 = arith.constant 0 : index
    %c0_12 = arith.constant 0 : index
    %24 = vector.load %arg3[%c0_10, %c0_11, %c0_12] : memref<1x8x6xf32, #tpu.memory_space<vmem>>, vector<1x8x6xf32>
    %25 = vector.shape_cast %24 : vector<1x8x6xf32> to vector<8x6xf32>
    %c0_13 = arith.constant 0 : index
    %c0_14 = arith.constant 0 : index
    %26 = vector.load %arg7[%c0_13, %c0_14] : memref<3x64xf32, #tpu.memory_space<vmem>>, vector<3x64xf32>
    %c0_15 = arith.constant 0 : index
    %c0_16 = arith.constant 0 : index
    %27 = vector.load %arg9[%c0_15, %c0_16] : memref<64x32xf32, #tpu.memory_space<vmem>>, vector<64x32xf32>
    %c0_17 = arith.constant 0 : index
    %c0_18 = arith.constant 0 : index
    %c0_19 = arith.constant 0 : index
    %28 = vector.load %arg4[%c0_17, %c0_18, %c0_19] : memref<1x1x32xf32, #tpu.memory_space<vmem>>, vector<1x1x32xf32>
    %29 = vector.shape_cast %28 : vector<1x1x32xf32> to vector<1x32xf32>
    %30 = vector.extract_strided_slice %25 {offsets = [0, 0], sizes = [8, 3], strides = [1, 1]} : vector<8x6xf32> to vector<8x3xf32>
    %31 = vector.extract_strided_slice %30 {offsets = [0, 0], sizes = [8, 1], strides = [1, 1]} : vector<8x3xf32> to vector<8x1xf32>
    %32 = vector.extract_strided_slice %26 {offsets = [0, 0], sizes = [1, 64], strides = [1, 1]} : vector<3x64xf32> to vector<1x64xf32>
    %33 = vector.broadcast %31 : vector<8x1xf32> to vector<8x64xf32>
    %34 = vector.broadcast %32 : vector<1x64xf32> to vector<8x64xf32>
    %35 = arith.mulf %33, %34 : vector<8x64xf32>
    %36 = vector.extract_strided_slice %30 {offsets = [0, 1], sizes = [8, 1], strides = [1, 1]} : vector<8x3xf32> to vector<8x1xf32>
    %37 = vector.extract_strided_slice %26 {offsets = [1, 0], sizes = [1, 64], strides = [1, 1]} : vector<3x64xf32> to vector<1x64xf32>
    %38 = vector.broadcast %36 : vector<8x1xf32> to vector<8x64xf32>
    %39 = vector.broadcast %37 : vector<1x64xf32> to vector<8x64xf32>
    %40 = arith.mulf %38, %39 : vector<8x64xf32>
    %41 = arith.addf %35, %40 : vector<8x64xf32>
    %42 = vector.extract_strided_slice %30 {offsets = [0, 2], sizes = [8, 1], strides = [1, 1]} : vector<8x3xf32> to vector<8x1xf32>
    %43 = vector.extract_strided_slice %26 {offsets = [2, 0], sizes = [1, 64], strides = [1, 1]} : vector<3x64xf32> to vector<1x64xf32>
    %44 = vector.broadcast %42 : vector<8x1xf32> to vector<8x64xf32>
    %45 = vector.broadcast %43 : vector<1x64xf32> to vector<8x64xf32>
    %46 = arith.mulf %44, %45 : vector<8x64xf32>
    %47 = arith.addf %41, %46 : vector<8x64xf32>
    %c0_20 = arith.constant 0 : index
    %c0_21 = arith.constant 0 : index
    %48 = vector.load %arg8[%c0_20, %c0_21] : memref<1x64xf32, #tpu.memory_space<vmem>>, vector<1x64xf32>
    %49 = vector.broadcast %48 : vector<1x64xf32> to vector<8x64xf32>
    %50 = arith.addf %47, %49 : vector<8x64xf32>
    %cst_22 = arith.constant 0.000000e+00 : f32
    %51 = vector.broadcast %cst_22 : f32 to vector<8x64xf32>
    %52 = arith.maximumf %50, %51 : vector<8x64xf32>
    %cst_23 = arith.constant dense<0.000000e+00> : vector<8x32xf32>
    %53 = tpu.matmul %52, %27, %cst_23 {dimension_numbers = #tpu.dot_dimension_numbers<[1], [0], [0], [1], [0, 0, 1, 1], [], []>} : vector<8x64xf32>, vector<64x32xf32>, vector<8x32xf32> -> vector<8x32xf32>
    %c0_24 = arith.constant 0 : index
    %c0_25 = arith.constant 0 : index
    %54 = vector.load %arg10[%c0_24, %c0_25] : memref<1x32xf32, #tpu.memory_space<vmem>>, vector<1x32xf32>
    %55 = vector.broadcast %54 : vector<1x32xf32> to vector<8x32xf32>
    %56 = arith.addf %53, %55 : vector<8x32xf32>
    %cst_26 = arith.constant dense<0.000000e+00> : vector<8xf32>
    %57 = vector.multi_reduction <add>, %56, %cst_26 [1] : vector<8x32xf32> to vector<8xf32>
    %58 = vector.shape_cast %57 : vector<8xf32> to vector<8x1xf32>
    %cst_27 = arith.constant 3.200000e+01 : f32
    %59 = vector.broadcast %cst_27 : f32 to vector<8x1xf32>
    %60 = arith.divf %58, %59 : vector<8x1xf32>
    %61 = vector.broadcast %60 : vector<8x1xf32> to vector<8x32xf32>
    %62 = arith.subf %56, %61 : vector<8x32xf32>
    %63 = arith.mulf %62, %62 : vector<8x32xf32>
    %cst_28 = arith.constant dense<0.000000e+00> : vector<8xf32>
    %64 = vector.multi_reduction <add>, %63, %cst_28 [1] : vector<8x32xf32> to vector<8xf32>
    %65 = vector.shape_cast %64 : vector<8xf32> to vector<8x1xf32>
    %cst_29 = arith.constant 3.200000e+01 : f32
    %66 = vector.broadcast %cst_29 : f32 to vector<8x1xf32>
    %67 = arith.divf %65, %66 : vector<8x1xf32>
    %cst_30 = arith.constant 9.99999974E-6 : f32
    %68 = vector.broadcast %cst_30 : f32 to vector<8x1xf32>
    %69 = arith.addf %67, %68 : vector<8x1xf32>
    %70 = math.rsqrt %69 : vector<8x1xf32>
    %71 = vector.broadcast %70 : vector<8x1xf32> to vector<8x32xf32>
    %72 = arith.mulf %62, %71 : vector<8x32xf32>
    %c0_31 = arith.constant 0 : index
    %c0_32 = arith.constant 0 : index
    %73 = vector.load %arg11[%c0_31, %c0_32] : memref<1x32xf32, #tpu.memory_space<vmem>>, vector<1x32xf32>
    %74 = vector.broadcast %73 : vector<1x32xf32> to vector<8x32xf32>
    %75 = arith.mulf %72, %74 : vector<8x32xf32>
    %c0_33 = arith.constant 0 : index
    %c0_34 = arith.constant 0 : index
    %76 = vector.load %arg12[%c0_33, %c0_34] : memref<1x32xf32, #tpu.memory_space<vmem>>, vector<1x32xf32>
    %77 = vector.broadcast %76 : vector<1x32xf32> to vector<8x32xf32>
    %78 = arith.addf %75, %77 : vector<8x32xf32>
    %79 = vector.broadcast %29 : vector<1x32xf32> to vector<8x32xf32>
    %80 = arith.addf %79, %78 : vector<8x32xf32>
    %81 = vector.extract_strided_slice %25 {offsets = [0, 3], sizes = [8, 3], strides = [1, 1]} : vector<8x6xf32> to vector<8x3xf32>
    %82 = vector.extract_strided_slice %81 {offsets = [0, 0], sizes = [8, 1], strides = [1, 1]} : vector<8x3xf32> to vector<8x1xf32>
    %83 = vector.extract_strided_slice %26 {offsets = [0, 0], sizes = [1, 64], strides = [1, 1]} : vector<3x64xf32> to vector<1x64xf32>
    %84 = vector.broadcast %82 : vector<8x1xf32> to vector<8x64xf32>
    %85 = vector.broadcast %83 : vector<1x64xf32> to vector<8x64xf32>
    %86 = arith.mulf %84, %85 : vector<8x64xf32>
    %87 = vector.extract_strided_slice %81 {offsets = [0, 1], sizes = [8, 1], strides = [1, 1]} : vector<8x3xf32> to vector<8x1xf32>
    %88 = vector.extract_strided_slice %26 {offsets = [1, 0], sizes = [1, 64], strides = [1, 1]} : vector<3x64xf32> to vector<1x64xf32>
    %89 = vector.broadcast %87 : vector<8x1xf32> to vector<8x64xf32>
    %90 = vector.broadcast %88 : vector<1x64xf32> to vector<8x64xf32>
    %91 = arith.mulf %89, %90 : vector<8x64xf32>
    %92 = arith.addf %86, %91 : vector<8x64xf32>
    %93 = vector.extract_strided_slice %81 {offsets = [0, 2], sizes = [8, 1], strides = [1, 1]} : vector<8x3xf32> to vector<8x1xf32>
    %94 = vector.extract_strided_slice %26 {offsets = [2, 0], sizes = [1, 64], strides = [1, 1]} : vector<3x64xf32> to vector<1x64xf32>
    %95 = vector.broadcast %93 : vector<8x1xf32> to vector<8x64xf32>
    %96 = vector.broadcast %94 : vector<1x64xf32> to vector<8x64xf32>
    %97 = arith.mulf %95, %96 : vector<8x64xf32>
    %98 = arith.addf %92, %97 : vector<8x64xf32>
    %c0_35 = arith.constant 0 : index
    %c0_36 = arith.constant 0 : index
    %99 = vector.load %arg8[%c0_35, %c0_36] : memref<1x64xf32, #tpu.memory_space<vmem>>, vector<1x64xf32>
    %100 = vector.broadcast %99 : vector<1x64xf32> to vector<8x64xf32>
    %101 = arith.addf %98, %100 : vector<8x64xf32>
    %cst_37 = arith.constant 0.000000e+00 : f32
    %102 = vector.broadcast %cst_37 : f32 to vector<8x64xf32>
    %103 = arith.maximumf %101, %102 : vector<8x64xf32>
    %cst_38 = arith.constant dense<0.000000e+00> : vector<8x32xf32>
    %104 = tpu.matmul %103, %27, %cst_38 {dimension_numbers = #tpu.dot_dimension_numbers<[1], [0], [0], [1], [0, 0, 1, 1], [], []>} : vector<8x64xf32>, vector<64x32xf32>, vector<8x32xf32> -> vector<8x32xf32>
    %c0_39 = arith.constant 0 : index
    %c0_40 = arith.constant 0 : index
    %105 = vector.load %arg10[%c0_39, %c0_40] : memref<1x32xf32, #tpu.memory_space<vmem>>, vector<1x32xf32>
    %106 = vector.broadcast %105 : vector<1x32xf32> to vector<8x32xf32>
    %107 = arith.addf %104, %106 : vector<8x32xf32>
    %cst_41 = arith.constant dense<0.000000e+00> : vector<8xf32>
    %108 = vector.multi_reduction <add>, %107, %cst_41 [1] : vector<8x32xf32> to vector<8xf32>
    %109 = vector.shape_cast %108 : vector<8xf32> to vector<8x1xf32>
    %cst_42 = arith.constant 3.200000e+01 : f32
    %110 = vector.broadcast %cst_42 : f32 to vector<8x1xf32>
    %111 = arith.divf %109, %110 : vector<8x1xf32>
    %112 = vector.broadcast %111 : vector<8x1xf32> to vector<8x32xf32>
    %113 = arith.subf %107, %112 : vector<8x32xf32>
    %114 = arith.mulf %113, %113 : vector<8x32xf32>
    %cst_43 = arith.constant dense<0.000000e+00> : vector<8xf32>
    %115 = vector.multi_reduction <add>, %114, %cst_43 [1] : vector<8x32xf32> to vector<8xf32>
    %116 = vector.shape_cast %115 : vector<8xf32> to vector<8x1xf32>
    %cst_44 = arith.constant 3.200000e+01 : f32
    %117 = vector.broadcast %cst_44 : f32 to vector<8x1xf32>
    %118 = arith.divf %116, %117 : vector<8x1xf32>
    %cst_45 = arith.constant 9.99999974E-6 : f32
    %119 = vector.broadcast %cst_45 : f32 to vector<8x1xf32>
    %120 = arith.addf %118, %119 : vector<8x1xf32>
    %121 = math.rsqrt %120 : vector<8x1xf32>
    %122 = vector.broadcast %121 : vector<8x1xf32> to vector<8x32xf32>
    %123 = arith.mulf %113, %122 : vector<8x32xf32>
    %c0_46 = arith.constant 0 : index
    %c0_47 = arith.constant 0 : index
    %124 = vector.load %arg11[%c0_46, %c0_47] : memref<1x32xf32, #tpu.memory_space<vmem>>, vector<1x32xf32>
    %125 = vector.broadcast %124 : vector<1x32xf32> to vector<8x32xf32>
    %126 = arith.mulf %123, %125 : vector<8x32xf32>
    %c0_48 = arith.constant 0 : index
    %c0_49 = arith.constant 0 : index
    %127 = vector.load %arg12[%c0_48, %c0_49] : memref<1x32xf32, #tpu.memory_space<vmem>>, vector<1x32xf32>
    %128 = vector.broadcast %127 : vector<1x32xf32> to vector<8x32xf32>
    %129 = arith.addf %126, %128 : vector<8x32xf32>
    %130 = arith.addf %80, %129 : vector<8x32xf32>
    %c0_50 = arith.constant 0 : index
    %c0_51 = arith.constant 0 : index
    %131 = vector.load %arg13[%c0_50, %c0_51] : memref<32x32xf32, #tpu.memory_space<vmem>>, vector<32x32xf32>
    %cst_52 = arith.constant dense<0.000000e+00> : vector<8x32xf32>
    %132 = tpu.matmul %23, %131, %cst_52 {dimension_numbers = #tpu.dot_dimension_numbers<[1], [0], [0], [1], [0, 0, 1, 1], [], []>} : vector<8x32xf32>, vector<32x32xf32>, vector<8x32xf32> -> vector<8x32xf32>
    %c0_53 = arith.constant 0 : index
    %c0_54 = arith.constant 0 : index
    %133 = vector.load %arg15[%c0_53, %c0_54] : memref<32x32xf32, #tpu.memory_space<vmem>>, vector<32x32xf32>
    %cst_55 = arith.constant dense<0.000000e+00> : vector<8x32xf32>
    %134 = tpu.matmul %130, %133, %cst_55 {dimension_numbers = #tpu.dot_dimension_numbers<[1], [0], [0], [1], [0, 0, 1, 1], [], []>} : vector<8x32xf32>, vector<32x32xf32>, vector<8x32xf32> -> vector<8x32xf32>
    %135 = arith.addf %132, %134 : vector<8x32xf32>
    %c0_56 = arith.constant 0 : index
    %c0_57 = arith.constant 0 : index
    %136 = vector.load %arg17[%c0_56, %c0_57] : memref<1x32xf32, #tpu.memory_space<vmem>>, vector<1x32xf32>
    %137 = vector.broadcast %136 : vector<1x32xf32> to vector<8x32xf32>
    %138 = arith.addf %135, %137 : vector<8x32xf32>
    %c0_58 = arith.constant 0 : index
    %c0_59 = arith.constant 0 : index
    %139 = vector.load %arg14[%c0_58, %c0_59] : memref<32x32xf32, #tpu.memory_space<vmem>>, vector<32x32xf32>
    %cst_60 = arith.constant dense<0.000000e+00> : vector<8x32xf32>
    %140 = tpu.matmul %23, %139, %cst_60 {dimension_numbers = #tpu.dot_dimension_numbers<[1], [0], [0], [1], [0, 0, 1, 1], [], []>} : vector<8x32xf32>, vector<32x32xf32>, vector<8x32xf32> -> vector<8x32xf32>
    %c0_61 = arith.constant 0 : index
    %c0_62 = arith.constant 0 : index
    %141 = vector.load %arg16[%c0_61, %c0_62] : memref<32x32xf32, #tpu.memory_space<vmem>>, vector<32x32xf32>
    %cst_63 = arith.constant dense<0.000000e+00> : vector<8x32xf32>
    %142 = tpu.matmul %130, %141, %cst_63 {dimension_numbers = #tpu.dot_dimension_numbers<[1], [0], [0], [1], [0, 0, 1, 1], [], []>} : vector<8x32xf32>, vector<32x32xf32>, vector<8x32xf32> -> vector<8x32xf32>
    %143 = arith.addf %140, %142 : vector<8x32xf32>
    %c0_64 = arith.constant 0 : index
    %c0_65 = arith.constant 0 : index
    %144 = vector.load %arg18[%c0_64, %c0_65] : memref<1x32xf32, #tpu.memory_space<vmem>>, vector<1x32xf32>
    %145 = vector.broadcast %144 : vector<1x32xf32> to vector<8x32xf32>
    %146 = arith.addf %143, %145 : vector<8x32xf32>
    %147 = arith.mulf %138, %23 : vector<8x32xf32>
    %148 = arith.addf %147, %146 : vector<8x32xf32>
    %c0_66 = arith.constant 0 : index
    %c0_67 = arith.constant 0 : index
    %c0_68 = arith.constant 0 : index
    %149 = vector.load %arg19[%c0_66, %c0_67, %c0_68] : memref<1x8x32xf32, #tpu.memory_space<vmem>>, vector<1x8x32xf32>
    %150 = vector.shape_cast %149 : vector<1x8x32xf32> to vector<8x32xf32>
    %151 = vector.shape_cast %148 : vector<8x32xf32> to vector<1x8x32xf32>
    tpu.vector_store %arg19[%c0_66, %c0_67, %c0_68], %151 {strides = array<i32>} : memref<1x8x32xf32, #tpu.memory_space<vmem>>, vector<1x8x32xf32>,
    return
  }
  func.func @transform_0(%arg0: i32, %arg1: i32) -> (i32, i32, i32) {
    %c0_i32 = arith.constant 0 : i32
    %c0_i32_0 = arith.constant 0 : i32
    return %arg0, %arg1, %c0_i32 : i32, i32, i32
  }
  func.func @transform_1(%arg0: i32, %arg1: i32) -> (i32, i32, i32) {
    %c0_i32 = arith.constant 0 : i32
    %c0_i32_0 = arith.constant 0 : i32
    return %arg0, %arg1, %c0_i32 : i32, i32, i32
  }
  func.func @transform_2(%arg0: i32, %arg1: i32) -> (i32, i32, i32) {
    %c0_i32 = arith.constant 0 : i32
    %c0_i32_0 = arith.constant 0 : i32
    %c0_i32_1 = arith.constant 0 : i32
    return %arg0, %c0_i32, %c0_i32_0 : i32, i32, i32
  }
  func.func @transform_3(%arg0: i32, %arg1: i32) -> (i32, i32) {
    %c0_i32 = arith.constant 0 : i32
    %c0_i32_0 = arith.constant 0 : i32
    %c0_i32_1 = arith.constant 0 : i32
    return %c0_i32, %c0_i32_0 : i32, i32
  }
  func.func @transform_4(%arg0: i32, %arg1: i32) -> (i32, i32) {
    %c0_i32 = arith.constant 0 : i32
    %c0_i32_0 = arith.constant 0 : i32
    %c0_i32_1 = arith.constant 0 : i32
    return %c0_i32, %c0_i32_0 : i32, i32
  }
  func.func @transform_5(%arg0: i32, %arg1: i32) -> (i32, i32) {
    %c0_i32 = arith.constant 0 : i32
    %c0_i32_0 = arith.constant 0 : i32
    %c0_i32_1 = arith.constant 0 : i32
    return %c0_i32, %c0_i32_0 : i32, i32
  }
  func.func @transform_6(%arg0: i32, %arg1: i32) -> (i32, i32) {
    %c0_i32 = arith.constant 0 : i32
    %c0_i32_0 = arith.constant 0 : i32
    %c0_i32_1 = arith.constant 0 : i32
    return %c0_i32, %c0_i32_0 : i32, i32
  }
  func.func @transform_7(%arg0: i32, %arg1: i32) -> (i32, i32) {
    %c0_i32 = arith.constant 0 : i32
    %c0_i32_0 = arith.constant 0 : i32
    %c0_i32_1 = arith.constant 0 : i32
    return %c0_i32, %c0_i32_0 : i32, i32
  }
  func.func @transform_8(%arg0: i32, %arg1: i32) -> (i32, i32) {
    %c0_i32 = arith.constant 0 : i32
    %c0_i32_0 = arith.constant 0 : i32
    %c0_i32_1 = arith.constant 0 : i32
    return %c0_i32, %c0_i32_0 : i32, i32
  }
  func.func @transform_9(%arg0: i32, %arg1: i32) -> (i32, i32) {
    %c0_i32 = arith.constant 0 : i32
    %c0_i32_0 = arith.constant 0 : i32
    %c0_i32_1 = arith.constant 0 : i32
    return %c0_i32, %c0_i32_0 : i32, i32
  }
  func.func @transform_10(%arg0: i32, %arg1: i32) -> (i32, i32) {
    %c0_i32 = arith.constant 0 : i32
    %c0_i32_0 = arith.constant 0 : i32
    %c0_i32_1 = arith.constant 0 : i32
    return %c0_i32, %c0_i32_0 : i32, i32
  }
  func.func @transform_11(%arg0: i32, %arg1: i32) -> (i32, i32) {
    %c0_i32 = arith.constant 0 : i32
    %c0_i32_0 = arith.constant 0 : i32
    %c0_i32_1 = arith.constant 0 : i32
    return %c0_i32, %c0_i32_0 : i32, i32
  }
  func.func @transform_12(%arg0: i32, %arg1: i32) -> (i32, i32) {
    %c0_i32 = arith.constant 0 : i32
    %c0_i32_0 = arith.constant 0 : i32
    %c0_i32_1 = arith.constant 0 : i32
    return %c0_i32, %c0_i32_0 : i32, i32
  }
  func.func @transform_13(%arg0: i32, %arg1: i32) -> (i32, i32) {
    %c0_i32 = arith.constant 0 : i32
    %c0_i32_0 = arith.constant 0 : i32
    %c0_i32_1 = arith.constant 0 : i32
    return %c0_i32, %c0_i32_0 : i32, i32
  }
  func.func @transform_14(%arg0: i32, %arg1: i32) -> (i32, i32) {
    %c0_i32 = arith.constant 0 : i32
    %c0_i32_0 = arith.constant 0 : i32
    %c0_i32_1 = arith.constant 0 : i32
    return %c0_i32, %c0_i32_0 : i32, i32
  }
  func.func @transform_15(%arg0: i32, %arg1: i32) -> (i32, i32) {
    %c0_i32 = arith.constant 0 : i32
    %c0_i32_0 = arith.constant 0 : i32
    %c0_i32_1 = arith.constant 0 : i32
    return %c0_i32, %c0_i32_0 : i32, i32
  }
  func.func @transform_16(%arg0: i32, %arg1: i32) -> (i32, i32) {
    %c0_i32 = arith.constant 0 : i32
    %c0_i32_0 = arith.constant 0 : i32
    %c0_i32_1 = arith.constant 0 : i32
    return %c0_i32, %c0_i32_0 : i32, i32
  }
  func.func @transform_17(%arg0: i32, %arg1: i32) -> (i32, i32, i32) {
    %c0_i32 = arith.constant 0 : i32
    %c0_i32_0 = arith.constant 0 : i32
    return %arg0, %arg1, %c0_i32 : i32, i32, i32
  }
}

</mosaic_0001>

<bundles_post_ra>
// kernel: tpu_custom_call.1
= control target key start
LH: loop header
LB: loop body
LE: loop exit
PB: predicated region body
PF: predicated region fallthrough
CT: control target
= control target key end

     0   :  { %s2838_s0 = inlined_call_operand.hbm [shape: f32[2,8,32], index: 0, kind: input, shape index: {}]   ;;  %s2839_s1 = inlined_call_operand.vmem [shape: f32[2,8,6], index: 1, kind: input, shape index: {}]   ;;  %s2840_s2 = inlined_call_operand.hbm [shape: f32[2,1,32], index: 2, kind: input, shape index: {}]   ;;  %s2841_s3 = inlined_call_operand.vmem [shape: f32[1,32], index: 3, kind: input, shape index: {}]   ;;  %s2842_s4 = inlined_call_operand.hbm [shape: f32[1,32], index: 4, kind: input, shape index: {}]   ;;  %s2843_s5 = inlined_call_operand.hbm [shape: f32[3,64], index: 5, kind: input, shape index: {}]   ;;  %s2844_s6 = inlined_call_operand.hbm [shape: f32[1,64], index: 6, kind: input, shape index: {}]   ;;  %s2845_s7 = inlined_call_operand.vmem [shape: f32[64,32], index: 7, kind: input, shape index: {}]   ;;  %s2846_s8 = inlined_call_operand.hbm [shape: f32[1,32], index: 8, kind: input, shape index: {}]   ;;  %s2847_s9 = inlined_call_operand.hbm [shape: f32[1,32], index: 9, kind: input, shape index: {}]   ;;  %s2848_s10 = inlined_call_operand.hbm [shape: f32[1,32], index: 10, kind: input, shape index: {}]   ;;  %s2849_s11 = inlined_call_operand.vmem [shape: f32[32,32], index: 11, kind: input, shape index: {}]   ;;  %s2850_s12 = inlined_call_operand.vmem [shape: f32[32,32], index: 12, kind: input, shape index: {}]   ;;  %s2851_s13 = inlined_call_operand.vmem [shape: f32[32,32], index: 13, kind: input, shape index: {}]   ;;  %s2852_s14 = inlined_call_operand.vmem [shape: f32[32,32], index: 14, kind: input, shape index: {}]   ;;  %s2853_s15 = inlined_call_operand.vmem [shape: f32[1,32], index: 15, kind: input, shape index: {}]   ;;  %s2854_s16 = inlined_call_operand.vmem [shape: f32[1,32], index: 16, kind: input, shape index: {}]   ;;  %s2855_s17 = inlined_call_operand.hbm [shape: f32[2,8,32], index: 17, kind: output, shape index: {}]  }
   0x1   :  { %2865 = sst [smem:[#allocation24_spill]] %s2838_s0 }
   0x2   :  { %2866 = sst [smem:[#allocation25_spill]] %s2839_s1 }
   0x3   :  { %2867 = sst [smem:[#allocation26_spill]] %s2841_s3 }
   0x4   :  { %2868 = sst [smem:[#allocation27_spill]] %s2842_s4 }
   0x5   :  { %2869 = sst [smem:[#allocation28_spill]] %s2843_s5 }
   0x6   :  { %2870 = sst [smem:[#allocation29_spill]] %s2844_s6 }
   0x7   :  { %2871 = sst [smem:[#allocation30_spill]] %s2846_s8 }
   0x8   :  { %2872 = sst [smem:[#allocation31_spill]] %s2847_s9 }
   0x9   :  { %2873 = sst [smem:[#allocation32_spill]] %s2848_s10 }
   0xa   :  { %2874 = sst [smem:[#allocation33_spill]] %s2850_s12 }
   0xb   :  { %2875 = sst [smem:[#allocation34_spill]] %s2851_s13 }
   0xc   :  { %2876 = sst [smem:[#allocation35_spill]] %s2852_s14 }
   0xd   :  { %2877 = sst [smem:[#allocation36_spill]] %s2853_s15 }
   0xe   :  { %2878 = sst [smem:[#allocation37_spill]] %s2854_s16 }
   0xf   :  { %2879 = sst [smem:[#allocation38_spill]] %s2855_s17 }
  0x10   :  { %22 = vsyncpa [#allocation3], 0 }
  0x11   :  { %24 = vsyncpa [#allocation3 + $0x1], 0 }
  0x12   :  { %25 = vsyncpa [#allocation6], 0 }
  0x13   :  { %27 = vsyncpa [#allocation6 + $0x1], 0 }
  0x14   :  { %28 = vsyncpa [#allocation9], 0 }
  0x15   :  { %29 = vsyncpa [#allocation12], 0 }
  0x16   :  { %30 = vsyncpa [#allocation15], 0 }
  0x17   :  { %31 = vsyncpa [#allocation4], 0 }
  0x18   :  { %33 = vsyncpa [#allocation4 + $0x1], 0  ;;  %s2332_s24 = smov 0   ;;  %s2334_s25 = smov 0  }
  0x19   :  { %s2336_s26 = smov 0   ;;  %s2338_s27 = smov 0  }
  0x1a   :  { %s2340_s28 = smov 0   ;;  %s2342_s29 = smov 0  }
  0x1b LB: > { %s2363_s0 = sadd.s32 4294967295, %s2222_s29   ;;  %p1535_p0 = scmp.ge.s32.totalorder %s2222_s29, 1  ;;  %s2222_s29 = sphi %s2342_s29, %s39_s29   ;;  %s2218_s28 = sphi %s2340_s28, %s2922_s28   ;;  %s2214_s27 = sphi %s2338_s27, %s2921_s27   ;;  %s2210_s26 = sphi %s2336_s26, %s2920_s26   ;;  %s2206_s25 = sphi %s2334_s25, %s2919_s25   ;;  %s2202_s24 = sphi %s2332_s24, %s2918_s24  }
  0x1c   : > { %p2860_p1 = scmp.eq.s32.totalorder %s2363_s0, 0  ;;  %p460_p2 = scmp.lt.s32.totalorder %s2222_s29, 3 }
  0x1d   : > { %s2224_s18 = smov [#allocation7]   ;;  %s2225_s1 = smov [#allocation8]  }
  0x1e   : > { %p2368_p3 = pnand %p1535_p0, %p460_p2  ;;  %s476_s19 = sshll.u32 %s2224_s18, 4  ;;  %s477_s19 = int_to_ptr.vmem [resolvable:$true] %s476_s19 }
  0x1f   : > { %s487_s20 = sshll.u32 %s2225_s1, 4  ;;  %s2226_s22 = smov [#allocation11]   ;;  %s2381_s20 = int_to_ptr.vmem [resolvable:$true] %s487_s20 }
  0x20   : > { %s2880_s30 = scalar_select %p2368_p3, 1, 0 }
  0x21   : > { %p1773_p5 = pneg %p2368_p3  ;;  %s512_s23 = sshll.u32 %s2226_s22, 4  ;;  %s2383_s23 = int_to_ptr.vmem [resolvable:$true] %s512_s23 }
  0x22   : > { %s2882_s4 = sld [smem:[#allocation27_spill]] }
  0x23   : > { %p2377_p6 = pnand %p1773_p5, %p2860_p1 }
  0x25   : > { %p2393_p8 = pneg %p2377_p6 }
  0x28   : > { %s1892_s16 = scalar_lea.hbm %s2882_s4, 16 }
  0x29   : > { %p1893_p7 = scmp.ne.s32.totalorder %s2882_s4, %s1892_s16  ;;  %p1899_p11 = scmp.lt.u32.totalorder %s1892_s16, %s2882_s4 }
  0x2b   : > { %p1895_p9 = pnand %p2393_p8, %p1893_p7 }
  0x2d   : > { %p1896_p10 = pneg %p1895_p9 }
  0x2f   : > { %p1901_p12 = pnand %p1899_p11, %p1896_p10 }
  0x31   : > { %1904 = shalt.err (!%p1901_p12)
}
  0x32   : > { %s1905_s17 = scalar_lea.vmem %s477_s19, 16  ;;  %s1912_s14 = scalar_lea.vmem %s477_s19, 32 }
  0x33   : > { %p1906_p13 = scmp.ne.s32.totalorder %s477_s19, %s1905_s17  ;;  %p1913_p5 = scmp.lt.s32.totalorder %s477_s19, %s477_s19 }
  0x34   : > { %p1914_p4 = scmp.lt.s32.totalorder %s1912_s14, %s1905_s17 }
  0x35   : > { %p1908_p0 = pnand %p1906_p13, %p2393_p8 }
  0x36   : > { %p1915_p1 = por %p1914_p4, %p1913_p5 }
  0x37   : > { %p1909_p2 = pneg %p1908_p0 }
  0x39   : > { %p1916_p3 = pnand %p1915_p1, %p1909_p2 }
  0x3b   : > { %1919 = shalt.err (!%p1916_p3)
}
  0x3c   : > { %1776 = dma.hbm_to_vmem [thread:$0]  (!%p2377_p6), %s2882_s4, 16, %s477_s19, [#allocation6]  }
  0x3d   : > { %s2884_s5 = sld [smem:[#allocation28_spill]] }
  0x43   : > { %s1920_s22 = scalar_lea.hbm %s2884_s5, 64 }
  0x44   : > { %p1921_p7 = scmp.ne.s32.totalorder %s2884_s5, %s1920_s22  ;;  %p1927_p1 = scmp.lt.u32.totalorder %s1920_s22, %s2884_s5 }
  0x46   : > { %p1923_p9 = pnand %p1921_p7, %p2393_p8 }
  0x48   : > { %p1924_p4 = pneg %p1923_p9 }
  0x4a   : > { %p1929_p3 = pnand %p1927_p1, %p1924_p4 }
  0x4c   : > { %1932 = shalt.err (!%p1929_p3)
}
  0x4d   : > { %s1933_s19 = scalar_lea.vmem %s2381_s20, 64  ;;  %p1941_p13 = scmp.lt.s32.totalorder %s2381_s20, %s2381_s20 }
  0x4e   : > { %p1934_p10 = scmp.ne.s32.totalorder %s2381_s20, %s1933_s19  ;;  %p1942_p0 = scmp.lt.s32.totalorder %s1933_s19, %s1933_s19 }
  0x50   : > { %p1936_p11 = pnand %p1934_p10, %p2393_p8  ;;  %p1943_p2 = por %p1942_p0, %p1941_p13 }
  0x52   : > { %p1937_p12 = pneg %p1936_p11 }
  0x54   : > { %p1944_p5 = pnand %p1943_p2, %p1937_p12 }
  0x56   : > { %1947 = shalt.err (!%p1944_p5)
}
  0x57   : > { %1779 = dma.hbm_to_vmem [thread:$0]  (!%p2377_p6), %s2884_s5, 64, %s2381_s20, [#allocation9]  }
  0x58   : > { %s2885_s8 = sld [smem:[#allocation30_spill]] }
  0x5e   : > { %s1948_s12 = scalar_lea.hbm %s2885_s8, 16 }
  0x5f   : > { %p1949_p7 = scmp.ne.s32.totalorder %s2885_s8, %s1948_s12  ;;  %p1955_p1 = scmp.lt.u32.totalorder %s1948_s12, %s2885_s8 }
  0x61   : > { %p1951_p9 = pnand %p1949_p7, %p2393_p8 }
  0x63   : > { %p1952_p4 = pneg %p1951_p9 }
  0x65   : > { %p1957_p3 = pnand %p1955_p1, %p1952_p4 }
  0x67   : > { %1960 = shalt.err (!%p1957_p3)
}
  0x68   : > { %s1961_s20 = scalar_lea.vmem %s2383_s23, 16  ;;  %s1968_s19 = scalar_lea.vmem %s2383_s23, 32 }
  0x69   : > { %p1962_p10 = scmp.ne.s32.totalorder %s2383_s23, %s1961_s20  ;;  %p1969_p13 = scmp.lt.s32.totalorder %s2383_s23, %s2383_s23 }
  0x6a   : > { %p1970_p0 = scmp.lt.s32.totalorder %s1968_s19, %s1961_s20 }
  0x6b   : > { %p1964_p11 = pnand %p1962_p10, %p2393_p8 }
  0x6c   : > { %p1971_p2 = por %p1970_p0, %p1969_p13 }
  0x6d   : > { %p1965_p12 = pneg %p1964_p11 }
  0x6f   : > { %p1972_p5 = pnand %p1971_p2, %p1965_p12 }
  0x71   : > { %1975 = shalt.err (!%p1972_p5)
}
  0x72   : > { %1785 = dma.hbm_to_vmem [thread:$0]  (!%p2377_p6), %s2885_s8, 16, %s2383_s23, [#allocation12]  }
  0x73   : > { %s2227_s15 = smov [#allocation10]   ;;  %s2228_s12 = smov [#allocation13]  }
  0x74   : > { %s498_s18 = sshll.u32 %s2227_s15, 4  ;;  %s523_s16 = sshll.u32 %s2228_s12, 4  ;;  %s499_s18 = int_to_ptr.vmem [resolvable:$true] %s498_s18  ;;  %s524_s16 = int_to_ptr.vmem [resolvable:$true] %s523_s16 }
  0x75   : > { %s2886_s6 = sld [smem:[#allocation29_spill]] }
  0x7b   : > { %s1976_s14 = scalar_lea.hbm %s2886_s6, 16 }
  0x7c   : > { %p1977_p7 = scmp.ne.s32.totalorder %s2886_s6, %s1976_s14  ;;  %p1983_p1 = scmp.lt.u32.totalorder %s1976_s14, %s2886_s6 }
  0x7e   : > { %p1979_p9 = pnand %p1977_p7, %p2393_p8 }
  0x80   : > { %p1980_p4 = pneg %p1979_p9 }
  0x82   : > { %p1985_p3 = pnand %p1983_p1, %p1980_p4 }
  0x84   : > { %1988 = shalt.err (!%p1985_p3)
}
  0x85   : > { %s1989_s23 = scalar_lea.vmem %s499_s18, 16  ;;  %s1996_s13 = scalar_lea.vmem %s499_s18, 32 }
  0x86   : > { %p1990_p10 = scmp.ne.s32.totalorder %s499_s18, %s1989_s23  ;;  %p1997_p13 = scmp.lt.s32.totalorder %s499_s18, %s499_s18 }
  0x87   : > { %p1998_p0 = scmp.lt.s32.totalorder %s1996_s13, %s1989_s23 }
  0x88   : > { %p1992_p11 = pnand %p1990_p10, %p2393_p8 }
  0x89   : > { %p1999_p2 = por %p1998_p0, %p1997_p13 }
  0x8a   : > { %p1993_p12 = pneg %p1992_p11 }
  0x8c   : > { %p2000_p5 = pnand %p1999_p2, %p1993_p12 }
  0x8e   : > { %2003 = shalt.err (!%p2000_p5)
}
  0x8f   : > { %1782 = dma.hbm_to_vmem [thread:$0]  (!%p2377_p6), %s2886_s6, 16, %s499_s18, [#allocation9]  }
  0x90   : > { %s2887_s9 = sld [smem:[#allocation31_spill]] }
  0x96   : > { %s2004_s17 = scalar_lea.hbm %s2887_s9, 16 }
  0x97   : > { %p2005_p7 = scmp.ne.s32.totalorder %s2887_s9, %s2004_s17  ;;  %p2011_p1 = scmp.lt.u32.totalorder %s2004_s17, %s2887_s9 }
  0x99   : > { %p2007_p9 = pnand %p2005_p7, %p2393_p8 }
  0x9b   : > { %p2008_p4 = pneg %p2007_p9 }
  0x9d   : > { %p2013_p3 = pnand %p2011_p1, %p2008_p4 }
  0x9f   : > { %2016 = shalt.err (!%p2013_p3)
}
  0xa0   : > { %s2017_s23 = scalar_lea.vmem %s524_s16, 16  ;;  %s2024_s18 = scalar_lea.vmem %s524_s16, 32 }
  0xa1   : > { %p2018_p10 = scmp.ne.s32.totalorder %s524_s16, %s2017_s23  ;;  %p2025_p13 = scmp.lt.s32.totalorder %s524_s16, %s524_s16 }
  0xa2   : > { %p2026_p0 = scmp.lt.s32.totalorder %s2024_s18, %s2017_s23 }
  0xa3   : > { %p2020_p11 = pnand %p2018_p10, %p2393_p8 }
  0xa4   : > { %p2027_p2 = por %p2026_p0, %p2025_p13 }
  0xa5   : > { %p2021_p12 = pneg %p2020_p11 }
  0xa7   : > { %p2028_p5 = pnand %p2027_p2, %p2021_p12 }
  0xa9   : > { %2031 = shalt.err (!%p2028_p5)
}
  0xaa   : > { %1788 = dma.hbm_to_vmem [thread:$0]  (!%p2377_p6), %s2887_s9, 16, %s524_s16, [#allocation12]  }
  0xab   : > { %s2229_s12 = smov [#allocation14]   ;;  %s2888_s10 = sld [smem:[#allocation32_spill]] }
  0xac   : > { %s534_s4 = sshll.u32 %s2229_s12, 4  ;;  %s535_s4 = int_to_ptr.vmem [resolvable:$true] %s534_s4 }
  0xb1   : > { %s2032_s14 = scalar_lea.hbm %s2888_s10, 16 }
  0xb2   : > { %p2033_p7 = scmp.ne.s32.totalorder %s2888_s10, %s2032_s14  ;;  %p2039_p1 = scmp.lt.u32.totalorder %s2032_s14, %s2888_s10 }
  0xb4   : > { %p2035_p9 = pnand %p2033_p7, %p2393_p8 }
  0xb6   : > { %p2036_p4 = pneg %p2035_p9 }
  0xb8   : > { %p2041_p3 = pnand %p2039_p1, %p2036_p4 }
  0xba   : > { %2044 = shalt.err (!%p2041_p3)
}
  0xbb   : > { %s2045_s16 = scalar_lea.vmem %s535_s4, 16  ;;  %s2052_s18 = scalar_lea.vmem %s535_s4, 32 }
  0xbc   : > { %p2046_p10 = scmp.ne.s32.totalorder %s535_s4, %s2045_s16  ;;  %p2053_p13 = scmp.lt.s32.totalorder %s535_s4, %s535_s4 }
  0xbd   : > { %p2054_p0 = scmp.lt.s32.totalorder %s2052_s18, %s2045_s16 }
  0xbe   : > { %p2048_p11 = pnand %p2046_p10, %p2393_p8 }
  0xbf   : > { %p2055_p2 = por %p2054_p0, %p2053_p13 }
  0xc0   : > { %p2049_p12 = pneg %p2048_p11 }
  0xc2   : > { %p2056_p5 = pnand %p2055_p2, %p2049_p12 }
  0xc4   : > { %2059 = shalt.err (!%p2056_p5)
}
  0xc5   : > { %1791 = dma.hbm_to_vmem [thread:$0]  (!%p2377_p6), %s2888_s10, 16, %s535_s4, [#allocation15]  }
  0xc6   : > { %s1534_s1 = sadd.s32 4294967294, %s2222_s29   ;;  %s51_s12 = sadd.s32 1, %s2218_s28 }
  0xc7   : > { %p53_p8 = scmp.ge.s32.totalorder %s51_s12, 2  ;;  %s60_s21 = sadd.s32 1, %s2210_s26 }
  0xc8   : > { %p67_p7 = scmp.ne.s32.totalorder %s2210_s26, %s2206_s25  ;;  %p68_p9 = scmp.eq.s32.totalorder %s2222_s29, 0 }
  0xc9   : > { %s2924_s12 = smov (%p53_p8, %s51_s12), 0  ;;  %p73_p1 = scmp.ne.s32.totalorder %s2206_s25, %s2202_s24 }
  0xca   : > { %p2518_p4 = por %p68_p9, %p67_p7  ;;  %s55_s4 = ssub.s32 %s2218_s28, %s2924_s12 }
  0xcb   : > { %p447_p6 = scmp.eq.s32.totalorder %s2363_s0, 1  ;;  %p58_p3 = scmp.eq.s32.totalorder %s55_s4, 0 }
  0xcc   : > { %p2890_p10 = scmp.eq.s32.totalorder %s2363_s0, 0  ;;  %p453_p13 = scmp.eq.s32.totalorder %s1534_s1, 1 }
  0xcd   : > { %p2533_p12 = por %p447_p6, %p67_p7  ;;  %p1809_p2 = scmp.lt.s32.totalorder %s2222_s29, 2 }
  0xce   : > { %p2529_p11 = por %p2890_p10, %p73_p1  ;;  %p2540_p0 = por %p453_p13, %p73_p1 }
  0xcf   : > { %s2892_s14 = scalar_select %p2533_p12, 1, 0 }
  0xd0   : > { %s2891_s17 = scalar_select %p2529_p11, 1, 0 }
  0xd1   : > { %s2538_s20 = scalar_select %p58_p3, %s2210_s26, %s60_s21  }
  0xd2   : > { %s2893_s19 = scalar_select %p2540_p0, 1, 0 }
  0xd3   : > { %s2546_s3 = sand.u32 1, %s2210_s26   ;;  %s1544_s23 = sshll.u32 %s2218_s28, 7 }
  0xd4   : > { %s1543_s16 = sshll.u32 %s2546_s3, 3  ;;  %s2894_s15 = sld [smem:[#allocation24_spill]] }
  0xd5   : > { %s567_s1 = scalar_lea.vmem [#allocation2], %s1543_s16  ;;  %p2557_p5 = pnand %p1809_p2, %p2518_p4 }
  0xd6   : > { %s575_s21 = sshll.u32 %s567_s1, 4  ;;  %s564_s8 = scalar_lea.sflag [#allocation3], %s2546_s3  ;;  %s2561_s21 = int_to_ptr.vmem [resolvable:$true] %s575_s21 }
  0xd7   : > { %p2062_p7 = pneg %p2557_p5 }
  0xda   : > { %s2553_s4 = scalar_lea.hbm %s2894_s15, %s1544_s23  ;;  %s2065_s16 = scalar_lea.hbm %s2894_s15, 256 }
  0xdb   : > { %s2060_s18 = scalar_lea.hbm %s2553_s4, 128  ;;  %p2066_p4 = scmp.lt.u32.totalorder %s2553_s4, %s2894_s15 }
  0xdc   : > { %p2061_p8 = scmp.ne.s32.totalorder %s2553_s4, %s2060_s18  ;;  %p2067_p6 = scmp.lt.u32.totalorder %s2065_s16, %s2060_s18 }
  0xdd   : > { %p2069_p10 = scmp.lt.u32.totalorder %s2060_s18, %s2553_s4 }
  0xde   : > { %p2063_p9 = pnand %p2062_p7, %p2061_p8  ;;  %p2068_p3 = por %p2067_p6, %p2066_p4 }
  0xe0   : > { %p2064_p1 = pneg %p2063_p9  ;;  %p2070_p13 = por %p2069_p10, %p2068_p3 }
  0xe2   : > { %p2071_p2 = pnand %p2070_p13, %p2064_p1 }
  0xe4   : > { %2074 = shalt.err (!%p2071_p2)
}
  0xe5   : > { %s2075_s6 = scalar_lea.vmem %s2561_s21, 128  ;;  %s2230_s23 = smov [#allocation2]  }
  0xe6   : > { %p2076_p8 = scmp.ne.s32.totalorder %s2561_s21, %s2075_s6  ;;  %s2080_s22 = sshll.u32 %s2230_s23, 4  ;;  %s2081_s22 = int_to_ptr.vmem [resolvable:$false] %s2080_s22 }
  0xe7   : > { %s2082_s13 = scalar_lea.vmem %s2081_s22, 256  ;;  %p2083_p12 = scmp.lt.s32.totalorder %s2561_s21, %s2081_s22 }
  0xe8   : > { %p2078_p9 = pnand %p2076_p8, %p2062_p7  ;;  %p2084_p4 = scmp.lt.s32.totalorder %s2082_s13, %s2075_s6 }
  0xea   : > { %p2079_p0 = pneg %p2078_p9  ;;  %p2085_p6 = por %p2084_p4, %p2083_p12 }
  0xec   : > { %p2086_p3 = pnand %p2085_p6, %p2079_p0 }
  0xee   : > { %2089 = shalt.err (!%p2086_p3)
}
  0xef   : > { %1795 = dma.hbm_to_vmem [thread:$0]  (!%p2557_p5), %s2553_s4, 128, %s2561_s21, %s564_s8  }
  0xf0   : > { %s1545_s18 = sshll.u32 %s2218_s28, 4  ;;  %s595_s6 = scalar_lea.vmem [#allocation5], %s2546_s3 }
  0xf1   : > { %s2594_s23 = scalar_lea.hbm %s2840_s2, %s1545_s18  ;;  %s602_s22 = sshll.u32 %s595_s6, 4  ;;  %s603_s22 = int_to_ptr.vmem [resolvable:$true] %s602_s22 }
  0xf2   : > { %s2896_s13 = sand.u32 1, %s2222_s29   ;;  %s2090_s10 = scalar_lea.hbm %s2594_s23, 16 }
  0xf3   : > { %s593_s9 = scalar_lea.sflag [#allocation6], %s2896_s13  ;;  %p2091_p12 = scmp.ne.s32.totalorder %s2594_s23, %s2090_s10 }
  0xf4   : > { %s2095_s21 = scalar_lea.hbm %s2840_s2, 32  ;;  %p2096_p10 = scmp.lt.u32.totalorder %s2594_s23, %s2840_s2 }
  0xf5   : > { %p2093_p0 = pnand %p2091_p12, %p2062_p7  ;;  %p2097_p13 = scmp.lt.u32.totalorder %s2095_s21, %s2090_s10 }
  0xf6   : > { %p2099_p8 = scmp.lt.u32.totalorder %s2090_s10, %s2594_s23 }
  0xf7   : > { %p2094_p1 = pneg %p2093_p0  ;;  %p2098_p2 = por %p2097_p13, %p2096_p10 }
  0xf9   : > { %p2100_p9 = por %p2099_p8, %p2098_p2 }
  0xfb   : > { %p2101_p4 = pnand %p2100_p9, %p2094_p1 }
  0xfd   : > { %2104 = shalt.err (!%p2101_p4)
}
  0xfe   : > { %s2105_s3 = scalar_lea.vmem %s603_s22, 16  ;;  %s2231_s1 = smov [#allocation5]  }
  0xff   : > { %p2106_p6 = scmp.ne.s32.totalorder %s603_s22, %s2105_s3  ;;  %s2110_s6 = sshll.u32 %s2231_s1, 4  ;;  %s2111_s6 = int_to_ptr.vmem [resolvable:$false] %s2110_s6 }
 0x100   : > { %s2112_s13 = scalar_lea.vmem %s2111_s6, 32  ;;  %p2113_p0 = scmp.lt.s32.totalorder %s603_s22, %s2111_s6 }
 0x101   : > { %p2108_p3 = pnand %p2106_p6, %p2062_p7  ;;  %p2114_p11 = scmp.lt.s32.totalorder %s2112_s13, %s2105_s3 }
 0x103   : > { %p2109_p12 = pneg %p2108_p3  ;;  %p2115_p10 = por %p2114_p11, %p2113_p0 }
 0x105   : > { %p2116_p13 = pnand %p2115_p10, %p2109_p12 }
 0x107   : > { %2119 = shalt.err (!%p2116_p13)
}
 0x108   : > { %1798 = dma.hbm_to_vmem [thread:$0]  (!%p2557_p5), %s2594_s23, 16, %s603_s22, %s593_s9  }
 0x109   : > { %p2897_p1 = scmp.ne.s32.totalorder %s2880_s30, 0 }
 0x10a   : > { %s2621_s10 = sand.u32 (!%p2897_p1), 1, %s2206_s25   ;;  %p2898_p11 = scmp.ne.s32.totalorder (!%p2897_p1), %s2891_s17, 0 }
 0x10b   : > { %611 = sbr.rel (%p2897_p1) target bundleno = 1215 (0x4bf), region = 88  ;;  %s1547_s8 = sshll.u32 (!%p2897_p1), %s2621_s10, 3 }
 0x10c   : > { %s614_s4 = scalar_lea.sflag (!%p2897_p1), [#allocation3], %s2621_s10  ;;  %s2627_s21 = scalar_lea.vmem (!%p2897_p1), [#allocation2], %s1547_s8 }
 0x112   : > { %2173 = dma.done.wait (%p2898_p11), %s614_s4, 128  }
 0x113   : > { %2175 = vsyncadd (%p2898_p11), %s614_s4, 4294967168  ;;  %s622_s5 = sand.u32 1, %s2363_s0   ;;  %s625_s30 = scalar_lea.vmem [#allocation5], %s2621_s10 }
 0x114   : > { %s623_s9 = scalar_lea.sflag [#allocation6], %s622_s5 }
 0x115   : > { %2177 = dma.done.wait (%p2898_p11), %s623_s9, 16  }
 0x116   : > { %2179 = vsyncadd (%p2898_p11), %s623_s9, 4294967280  ;;  %p2899_p5 = scmp.eq.s32.totalorder %s2363_s0, 0 }
 0x118   : > { %2181 = dma.done.wait (%p2899_p5), [#allocation6], 16   ;;  %p2900_p7 = pmov %p2899_p5 }
 0x119   : > { %p2901_p2 = pmov %p2899_p5 }
 0x11a   : > { %2183 = vsyncadd (%p2900_p7), [#allocation6], 4294967280 }
 0x11b   : > { %2185 = dma.done.wait (%p2901_p2), [#allocation9], 80   ;;  %p2902_p8 = pmov %p2901_p2 }
 0x11c   : > { %p2903_p9 = pmov %p2901_p2 }
 0x11d   : > { %2187 = vsyncadd (%p2902_p8), [#allocation9], 4294967216 }
 0x11e   : > { %2189 = dma.done.wait (%p2903_p9), [#allocation12], 32   ;;  %p2904_p4 = pmov %p2901_p2 }
 0x11f   : > { %p2905_p6 = pmov %p2901_p2 }
 0x120   : > { %2191 = vsyncadd (%p2904_p4), [#allocation12], 4294967264 }
 0x121   : > { %2193 = dma.done.wait (%p2905_p6), [#allocation15], 16   ;;  %p2906_p3 = pmov %p2901_p2 }
 0x122   : > { %p711_p12 = scmp.lt.s32.totalorder %s2214_s27, 1  ;;  %v2232_v0 = vmov 2   ;;  %v2233_v1 = vmov 0   ;;  %v2234_v2 = vmov 0.0|0.0   ;;  %s2907_s16 = sld [smem:[#allocation25_spill]]  ;;  %v752_v4 = vld [vmem:[%s2845_s7] sm:$0xff]  ;;  %v766_v21 = vlaneseq }
 0x123   : > { %2195 = vsyncadd (%p2906_p3), [#allocation15], 4294967280  ;;  %1882 = vset.pattern.permute.xlu1 %v2232_v0  ;;  %1880 = vset.pattern.permute.xlu0 %v2233_v1  ;;  %v753_v5 = vld [vmem:[%s2845_s7 + $0x8] sm:$0xff]  ;;  %v754_v6 = vld [vmem:[%s2845_s7 + $0x10] sm:$0xff]  ;;  %v2235_v10 = vmov 3   ;;  %v2236_v11 = vmov 1  }
 0x124   : > { %s712_s17 = scalar_select %p711_p12, %s2214_s27, 1  ;;  %1695 = vmatprep.subr.bf16.mxu0 %v2234_v2  ;;  %1707 = vmatprep.subr.bf16.mxu1 %v2234_v2  ;;  %v755_v7 = vld [vmem:[%s2845_s7 + $0x18] sm:$0xff]  ;;  %v1696_v8 = vpack.c.bf16 %v753_v5, %v752_v4  ;;  %v756_v12 = vld [vmem:[%s2845_s7 + $0x20] sm:$0xff]  ;;  %v757_v13 = vld [vmem:[%s2845_s7 + $0x28] sm:$0xff]  ;;  %v2237_v15 = vmov 4   ;;  %v2238_v16 = vmov 5  }
 0x125   : > { %v1699_v9 = vpack.c.bf16 %v755_v7, %v754_v6  ;;  %v1702_v14 = vpack.c.bf16 %v757_v13, %v756_v12  ;;  %v758_v17 = vld [vmem:[%s2845_s7 + $0x30] sm:$0xff]  ;;  %v759_v18 = vld [vmem:[%s2845_s7 + $0x38] sm:$0xff]  ;;  %vm2239_vm0 = vmmov 0   ;;  %v2240_v20 = vmov 0.0   ;;  %v718_v55 = vld [vmem:[%s2627_s21] sm:$0xff]  ;;  %s2911_s21 = sld [smem:[#allocation35_spill]] }
 0x126   : > { %s1555_s23 = sshll.u32 %s712_s17, 3  ;;  %1697 = vmatpush3.bf16.msra.mxu0 %v1696_v8  ;;  %1709 = vmatpush3.bf16.msra.mxu1 %v1696_v8  ;;  %v1705_v19 = vpack.c.bf16 %v759_v18, %v758_v17  ;;  %v767_v22 = vshrl.u32 %v766_v21, 7  ;;  %v751_v28 = vld [vmem:[#allocation8] sm:$0x7]  ;;  %v1558_v38 = vld [vmem:[#allocation10] ss:$0 sm:$0xff] }
 0x127   : > { %1698 = vmatprep.subr.bf16.mxu0 %v2234_v2  ;;  %1710 = vmatprep.subr.bf16.mxu1 %v2234_v2  ;;  %vm807_vm1 = vcmask 523264   ;;  %v1559_v51 = vld [vmem:[#allocation11] ss:$0 sm:$0xff]  ;;  %vm719_vm2 = vcmask 261120   ;;  %v1027_v21 = vld [vmem:[%s2849_s11 + $0x10] sm:$0xff]  ;;  %s2909_s17 = sld [smem:[#allocation26_spill]] }
 0x128   : > { %s717_s3 = scalar_lea.vmem %s2907_s16, %s1555_s23  ;;  %1629 = vmatprep.mubr.msk.f32.mxu0 %vm2239_vm0, %v2240_v20  ;;  %1648 = vmatprep.mubr.msk.f32.mxu1 %vm2239_vm0, %v2240_v20  ;;  %v768_v23 = vsub.s32 0, %v767_v22  ;;  %v777_v24 = vsub.s32 1, %v767_v22  ;;  %v787_v25 = vsub.s32 2, %v767_v22  ;;  %v720_v58 = vsel %vm719_vm2, %v718_v55, 0.0  ;;  %s2908_s23 = sld [smem:[#allocation34_spill]]  ;;  %v1028_v22 = vld [vmem:[%s2849_s11 + $0x18] sm:$0xff] }
 0x129   : > { %v750_v3 = vld [vmem:[%s717_s3] sm:$0xff]  ;;  %s2910_s16 = sld [smem:[#allocation33_spill]]  ;;  %s2912_s13 = sld [smem:[#allocation36_spill]] }
 0x12a   : > { %782 = vperm.xlu1 %1882, %v750_v3   ;;  %763 = vperm.xlu0 %1880, %v750_v3   ;;  %v769_v29 = vrot.slane %v751_v28, %v768_v23  ;;  %v778_v30 = vrot.slane %v751_v28, %v777_v24  ;;  %v788_v31 = vrot.slane %v751_v28, %v787_v25  ;;  %s2913_s9 = sld [smem:[#allocation37_spill]]  ;;  %s710_s22 = scalar_lea.vmem [#allocation16], %s1547_s8 }
 0x12b   : > { %1700 = vmatpush3.bf16.msra.mxu0 %v1699_v9  ;;  %1712 = vmatpush3.bf16.msra.mxu1 %v1699_v9  ;;  %v1729_v23 = vpack.c.bf16 %v1028_v22, %v1027_v21  ;;  %s2914_s0 = sld [smem:[#allocation38_spill]]  ;;  %s1347_s6 = scalar_lea.sflag [#allocation4], %s2621_s10 }
 0x12c   : > { %1701 = vmatprep.subr.bf16.mxu0 %v2234_v2  ;;  %1713 = vmatprep.subr.bf16.mxu1 %v2234_v2  ;;  %p2915_p10 = scmp.ne.s32.totalorder %s2892_s14, 0  ;;  %s2241_s8 = smov [#allocation16]  }
 0x12e   : > { %1883 = vset.pattern.permute.xlu1 %v2235_v10  ;;  %1881 = vset.pattern.permute.xlu0 %v2236_v11  ;;  %v1029_v17 = vld [vmem:[%s2908_s23] sm:$0xff]  ;;  %v1030_v18 = vld [vmem:[%s2908_s23 + $0x8] sm:$0xff]  ;;  %v1031_v24 = vld [vmem:[%s2908_s23 + $0x10] sm:$0xff] }
 0x12f   : > { %918 = vperm.xlu1 %1883, %v750_v3   ;;  %772 = vperm.xlu0 %1881, %v750_v3   ;;  %v1032_v25 = vld [vmem:[%s2908_s23 + $0x18] sm:$0xff] }
 0x130   : > { %1703 = vmatpush3.bf16.msra.mxu0 %v1702_v14  ;;  %1715 = vmatpush3.bf16.msra.mxu1 %v1702_v14  ;;  %v1025_v14 = vld [vmem:[%s2849_s11] sm:$0xff] }
 0x131   : > { %1704 = vmatprep.subr.bf16.mxu0 %v2234_v2  ;;  %1716 = vmatprep.subr.bf16.mxu1 %v2234_v2 }
 0x133   : > { %1884 = vset.pattern.permute.xlu1 %v2237_v15  ;;  %1885 = vset.pattern.permute.xlu0 %v2238_v16  ;;  %v1026_v15 = vld [vmem:[%s2849_s11 + $0x8] sm:$0xff] }
 0x134   : > { %923 = vperm.xlu1 %1884, %v750_v3   ;;  %929 = vperm.xlu0 %1885, %v750_v3   ;;  %v1726_v16 = vpack.c.bf16 %v1026_v15, %v1025_v14 }
 0x135   : > { %1706 = vmatpush3.bf16.msra.mxu0 %v1705_v19  ;;  %1718 = vmatpush3.bf16.msra.mxu1 %v1705_v19  ;;  %v1720_v19 = vpack.c.bf16 %v1030_v18, %v1029_v17 }
 0x136   : > { %1725 = vmatprep.subr.bf16.mxu1 %v2234_v2  ;;  %1719 = vmatprep.subr.bf16.mxu0 %v2234_v2 }
 0x1a9   : > { %v783_v26 = vpop.permute.xlu1 %782  ;;  %v764_v27 = vpop.permute.xlu0 %763 }
 0x1aa   : > { %v770_v34 = vmul.f32 %v769_v29, %v764_v27  ;;  %v789_v36 = vmul.f32 %v788_v31, %v783_v26  ;;  %v1723_v26 = vpack.c.bf16 %v1032_v25, %v1031_v24 }
 0x1ae   : > { %v919_v32 = vpop.permute.xlu1 %918  ;;  %v773_v33 = vpop.permute.xlu0 %772 }
 0x1af   : > { %v779_v35 = vmul.f32 %v778_v30, %v773_v33  ;;  %v921_v42 = vmul.f32 %v919_v32, %v769_v29 }
 0x1b1   : > { %v780_v37 = vadd.f32 %v779_v35, %v770_v34 }
 0x1b3   : > { %v790_v39 = vadd.f32 %v789_v36, %v780_v37  ;;  %v924_v40 = vpop.permute.xlu1 %923  ;;  %v930_v41 = vpop.permute.xlu0 %929  ;;  %v1561_v37 = vld [vmem:[#allocation13] ss:$0 sm:$0xff] }
 0x1b4   : > { %v926_v43 = vmul.f32 %v924_v40, %v778_v30  ;;  %v932_v44 = vmul.f32 %v930_v41, %v788_v31  ;;  %v1562_v40 = vld [vmem:[#allocation14] ss:$0 sm:$0xff] }
 0x1b5   : > { %v798_v45 = vadd.f32 %v1558_v38, %v790_v39 }
 0x1b6   : > { %v927_v46 = vadd.f32 %v926_v43, %v921_v42  ;;  %v1556_v42 = vld [vmem:[%s2909_s17] ss:$0 sm:$0xff]  ;;  %s1572_s17 = sshll.u32 %s2214_s27, 7 }
 0x1b7   : > { %v799_v47 = vmax.f32 %v798_v45, 0.0  ;;  %v1187_v45 = vld [vmem:[%s2910_s16] sm:$0xff]  ;;  %s2788_s1 = scalar_lea.hbm %s2914_s0, %s1572_s17 }
 0x1b8   : > { %v933_v48 = vadd.f32 %v932_v44, %v927_v46  ;;  %v1188_v46 = vld [vmem:[%s2910_s16 + $0x8] sm:$0xff] }
 0x1b9   : > { %1630 = vmatmul.mubr.msk.f32.vlgmr.msra.gmra.mrb[0].mxu0 %vm807_vm1, %v799_v47 }
 0x1ba   : > { %v934_v49 = vadd.f32 %v1558_v38, %v933_v48  ;;  %1659 = vmatprep.mubr.msk.f32.mxu0 %vm2239_vm0, %v2240_v20  ;;  %1721 = vmatpush3.bf16.msra.mxu0 %v1720_v19  ;;  %v1557_v48 = vld [vmem:[#allocation7] ss:$0 sm:$0xff] }
 0x1bb   : > { %1722 = vmatprep.subr.bf16.mxu0 %v2234_v2 }
 0x1bc   : > { %v935_v50 = vmax.f32 %v934_v49, 0.0 }
 0x1be   : > { %1649 = vmatmul.mubr.msk.f32.vlgmr.msra.gmra.mrb[0].mxu1 %vm807_vm1, %v935_v50  ;;  %1724 = vmatpush3.bf16.msra.mxu0 %v1723_v26 }
 0x1bf   : > { %1670 = vmatprep.mubr.msk.f32.mxu1 %vm2239_vm0, %v2240_v20  ;;  %1727 = vmatpush3.bf16.msra.mxu1 %v1726_v16 }
 0x1c0   : > { %1728 = vmatprep.subr.bf16.mxu1 %v2234_v2  ;;  %1731 = vmatprep.subr.bf16.mxu0 %v2234_v2 }
 0x1c3   : > { %1730 = vmatpush3.bf16.msra.mxu1 %v1729_v23 }
 0x1c4   : > { %1737 = vmatprep.subr.bf16.mxu1 %v2234_v2 }
 0x28c   : > { %v877_v52 = vpop.f32.mrb[0].mxu0 }
 0x28d   : > { %v878_v53 = vadd.f32 %v1559_v51, %v877_v52  ;;  %v1631_v54 = vpop.f32.mrb[1].mxu0 }
 0x28e   : > { %v1191_v54 = vld [vmem:[%s2911_s21] sm:$0xff] }
 0x28f   : > { %v881_v56 = vsel %vm719_vm2, %v878_v53, 0.0 }
 0x290   : > { %882 = vadd.xlane.f32.xlu1 %v881_v56 }
 0x291   : > { %v1005_v57 = vpop.f32.mrb[0].mxu1 }
 0x292   : > { %v1006_v59 = vadd.f32 %v1559_v51, %v1005_v57  ;;  %v1650_v60 = vpop.f32.mrb[1].mxu1  ;;  %v1563_v51 = vld [vmem:[%s625_s30] ss:$0 sm:$0xff]  ;;  %v1189_v57 = vld [vmem:[%s2910_s16 + $0x10] sm:$0xff]  ;;  %s1361_s30 = sshll.u32 %s710_s22, 4  ;;  %s2790_s30 = int_to_ptr.vmem [resolvable:$true] %s1361_s30 }
 0x293   : > { %s2120_s27 = scalar_lea.vmem %s2790_s30, 128 }
 0x294   : > { %721 = vadd.xlane.f32.xlu1 %v720_v58  ;;  %v1009_v61 = vsel %vm719_vm2, %v1006_v59, 0.0  ;;  %v1190_v58 = vld [vmem:[%s2910_s16 + $0x18] sm:$0xff]  ;;  %p2121_p0 = scmp.ne.s32.totalorder %s2790_s30, %s2120_s27 }
 0x295   : > { %1010 = vadd.xlane.f32.xlu0 %v1009_v61 }
 0x296   : > { %p2122_p13 = pnand %p2121_p0, %p2915_p10 }
 0x298   : > { %p2123_p1 = pneg %p2122_p13 }
 0x31d   : > { %v883_v62 = vpop.xlane.xlu1 %882 }
 0x31e   : > { %v884_v63 = vmul.f32 0.03125, %v883_v62 }
 0x320   : > { %v885_v0 = vsub.f32 %v878_v53, %v884_v63  ;;  %v1738_v53 = vpack.c.bf16 %v1188_v46, %v1187_v45  ;;  %v1741_v63 = vpack.c.bf16 %v1190_v58, %v1189_v57 }
 0x321   : > { %v722_v1 = vpop.xlane.xlu1 %721 }
 0x322   : > { %v724_v3 = vmul.f32 0.03125, %v722_v1  ;;  %v1011_v4 = vpop.xlane.xlu0 %1010  ;;  %v886_v5 = vmul.f32 %v885_v0, %v885_v0  ;;  %v1194_v1 = vld [vmem:[%s2911_s21 + $0x18] sm:$0xff] }
 0x323   : > { %v1012_v6 = vmul.f32 0.03125, %v1011_v4 }
 0x324   : > { %v725_v7 = vsub.f32 %v718_v55, %v724_v3  ;;  %v887_v8 = vsel %vm719_vm2, %v886_v5, 0.0  ;;  %v1192_v55 = vld [vmem:[%s2911_s21 + $0x8] sm:$0xff] }
 0x325   : > { %v1013_v9 = vsub.f32 %v1006_v59, %v1012_v6  ;;  %888 = vadd.xlane.f32.xlu0 %v887_v8  ;;  %v1732_v61 = vpack.c.bf16 %v1192_v55, %v1191_v54 }
 0x326   : > { %v726_v10 = vmul.f32 %v725_v7, %v725_v7 }
 0x327   : > { %v1014_v11 = vmul.f32 %v1013_v9, %v1013_v9 }
 0x328   : > { %v727_v12 = vsel %vm719_vm2, %v726_v10, 0.0 }
 0x329   : > { %728 = vadd.xlane.f32.xlu0 %v727_v12  ;;  %v1015_v13 = vsel %vm719_vm2, %v1014_v11, 0.0  ;;  %v1570_v12 = vld [vmem:[%s2913_s9] ss:$0 sm:$0xff] }
 0x32a   : > { %1016 = vadd.xlane.f32.xlu1 %v1015_v13 }
 0x3b2   : > { %v889_v27 = vpop.xlane.xlu0 %888 }
 0x3b3   : > { %v890_v28 = vmul.f32 0.03125, %v889_v27 }
 0x3b5   : > { %v891_v29 = vadd.f32 1e-05, %v890_v28 }
 0x3b6   : > { %v729_v30 = vpop.xlane.xlu0 %728 }
 0x3b7   : > { %1886 = vrsqrt.f32 %v891_v29  ;;  %v730_v31 = vmul.f32 0.03125, %v729_v30  ;;  %v1017_v32 = vpop.xlane.xlu1 %1016 }
 0x3b8   : > { %v1018_v33 = vmul.f32 0.03125, %v1017_v32 }
 0x3b9   : > { %v731_v34 = vadd.f32 1e-05, %v730_v31 }
 0x3ba   : > { %v1019_v35 = vadd.f32 1e-05, %v1018_v33 }
 0x3bb   : > { %1888 = vrsqrt.f32 %v731_v34 }
 0x3bc   : > { %1890 = vrsqrt.f32 %v1019_v35 }
 0x3c1   : > { %v1887_v36 = vpop.eup %1886 }
 0x3c2   : > { %v893_v38 = vmul.f32 %v1887_v36, %v885_v0  ;;  %v1193_v0 = vld [vmem:[%s2911_s21 + $0x10] sm:$0xff] }
 0x3c3   : > { %v1735_v3 = vpack.c.bf16 %v1194_v1, %v1193_v0 }
 0x3c4   : > { %v901_v39 = vmul.f32 %v1561_v37, %v893_v38 }
 0x3c5   : > { %v1889_v41 = vpop.eup %1888 }
 0x3c6   : > { %v1891_v43 = vpop.eup %1890  ;;  %v733_v44 = vmul.f32 %v1889_v41, %v725_v7  ;;  %v909_v49 = vadd.f32 %v1562_v40, %v901_v39 }
 0x3c7   : > { %v1021_v47 = vmul.f32 %v1891_v43, %v1013_v9  ;;  %v1567_v9 = vld [vmem:[%s2912_s13] ss:$0 sm:$0xff]  ;;  %s2124_s13 = sshll.u32 %s2241_s8, 4  ;;  %s2125_s13 = int_to_ptr.vmem [resolvable:$false] %s2124_s13 }
 0x3c8   : > { %v741_v50 = vmul.f32 %v1556_v42, %v733_v44  ;;  %v916_v59 = vadd.f32 %v1563_v51, %v909_v49  ;;  %s2126_s4 = scalar_lea.vmem %s2125_s13, 256  ;;  %p2127_p11 = scmp.lt.s32.totalorder %s2790_s30, %s2125_s13 }
 0x3c9   : > { %v1022_v52 = vmul.f32 %v1561_v37, %v1021_v47  ;;  %p2128_p5 = scmp.lt.s32.totalorder %s2126_s4, %s2120_s27 }
 0x3ca   : > { %v749_v56 = vadd.f32 %v1557_v48, %v741_v50 }
 0x3cb   : > { %v1023_v60 = vadd.f32 %v1562_v40, %v1022_v52  ;;  %p2129_p7 = por %p2128_p5, %p2127_p11 }
 0x3cc   : > { %1671 = vmatmul.mubr.msk.f32.vlgmr.msra.gmra.mrb[2].mxu1 %vm719_vm2, %v749_v56 }
 0x3cd   : > { %1739 = vmatpush3.bf16.msra.mxu1 %v1738_v53  ;;  %v1024_v62 = vadd.f32 %v1023_v60, %v916_v59  ;;  %1692 = vmatprep.mubr.msk.f32.mxu1 %vm2239_vm0, %v2240_v20  ;;  %p2130_p2 = pnand %p2129_p7, %p2123_p1 }
 0x3ce   : > { %1740 = vmatprep.subr.bf16.mxu1 %v2234_v2 }
 0x3cf   : > { %1660 = vmatmul.mubr.msk.f32.vlgmr.msra.gmra.mrb[2].mxu0 %vm719_vm2, %v1024_v62 }
 0x3d0   : > { %1733 = vmatpush3.bf16.msra.mxu0 %v1732_v61  ;;  %1681 = vmatprep.mubr.msk.f32.mxu0 %vm2239_vm0, %v2240_v20 }
 0x3d1   : > { %1742 = vmatpush3.bf16.msra.mxu1 %v1741_v63  ;;  %1734 = vmatprep.subr.bf16.mxu0 %v2234_v2 }
 0x3d4   : > { %1736 = vmatpush3.bf16.msra.mxu0 %v1735_v3  ;;  %1693 = vmatmul.mubr.msk.f32.vlgmr.msra.gmra.mrb[4].mxu1 %vm719_vm2, %v749_v56 }
 0x3d7   : > { %1682 = vmatmul.mubr.msk.f32.vlgmr.msra.gmra.mrb[4].mxu0 %vm719_vm2, %v1024_v62 }
 0x49f   : > { %v1175_v4 = vpop.f32.mrb[2].mxu1 }
 0x4a0   : > { %v1672_v5 = vpop.f32.mrb[3].mxu1 }
 0x4a2   : > { %v1102_v6 = vpop.f32.mrb[2].mxu0 }
 0x4a3   : > { %v1176_v7 = vadd.f32 %v1175_v4, %v1102_v6  ;;  %v1661_v8 = vpop.f32.mrb[3].mxu0 }
 0x4a5   : > { %v1186_v2 = vadd.f32 %v1567_v9, %v1176_v7 }
 0x4a7   : > { %v1331_v20 = vpop.f32.mrb[4].mxu1  ;;  %v1343_v15 = vmul.f32 %v1186_v2, %v749_v56 }
 0x4a8   : > { %v1694_v10 = vpop.f32.mrb[5].mxu1 }
 0x4aa   : > { %v1261_v11 = vpop.f32.mrb[4].mxu0 }
 0x4ab   : > { %v1332_v13 = vadd.f32 %v1331_v20, %v1261_v11  ;;  %v1683_v14 = vpop.f32.mrb[5].mxu0 }
 0x4ad   : > { %v1342_v16 = vadd.f32 %v1570_v12, %v1332_v13 }
 0x4af   : > { %v1344_v17 = vadd.f32 %v1343_v15, %v1342_v16 }
 0x4b1   : > { %1345 = vst.msk [vmem:[%s710_s22] sm:$0xff] %vm719_vm2, %v1344_v17 }
 0x4b2   : > { %2133 = shalt.err (!%p2130_p2)
}
 0x4b3   : > { %s2134_s10 = scalar_lea.hbm %s2788_s1, 128  ;;  %s2138_s17 = scalar_lea.hbm %s2914_s0, 256 }
 0x4b4   : > { %p2135_p8 = scmp.ne.s32.totalorder %s2788_s1, %s2134_s10  ;;  %p2139_p6 = scmp.lt.u32.totalorder %s2788_s1, %s2914_s0 }
 0x4b5   : > { %p2140_p3 = scmp.lt.u32.totalorder %s2138_s17, %s2134_s10  ;;  %p2142_p0 = scmp.lt.u32.totalorder %s2134_s10, %s2788_s1 }
 0x4b6   : > { %p2136_p9 = pnand %p2135_p8, %p2915_p10 }
 0x4b7   : > { %p2141_p12 = por %p2140_p3, %p2139_p6 }
 0x4b8   : > { %p2137_p4 = pneg %p2136_p9 }
 0x4b9   : > { %p2143_p13 = por %p2142_p0, %p2141_p12 }
 0x4bb   : > { %p2144_p1 = pnand %p2143_p13, %p2137_p4 }
 0x4bd   : > { %2147 = shalt.err (!%p2144_p1)
}
 0x4be   : > { %1771 = dma.vmem_to_hbm [thread:$0]  (%p2915_p10), %s2790_s30, 128, %s2788_s1, %s1347_s6  }
 0x4bf PF: > { %s1373_s3 = sand.u32 1, %s2202_s24   ;;  %p2916_p11 = scmp.ne.s32.totalorder %s2893_s19, 0 }
 0x4c0   : > { %p2917_p5 = scmp.ge.s32.totalorder %s2222_s29, 2  ;;  %s1374_s27 = scalar_lea.sflag [#allocation4], %s1373_s3 }
 0x4c2   : > { %p1800_p7 = pnand %p2917_p5, %p2916_p11 }
 0x4c4   : > { %2197 = dma.done.wait (!%p1800_p7), %s1374_s27, 128  }
 0x4c5   : > { %2199 = vsyncadd (!%p1800_p7), %s1374_s27, 4294967168  ;;  %s39_s29 = sadd.s32 1, %s2222_s29   ;;  %s2918_s24 = smov %s2206_s25 }
 0x4c6   : > { %p36_p2 = scmp.ge.s32.totalorder %s39_s29, 4   ;;  %s2919_s25 = smov %s2210_s26 }
 0x4c7   : > { %s2920_s26 = smov %s2538_s20  ;;  %s2921_s27 = smov %s2218_s28 }
 0x4c8   : > { %s2922_s28 = smov %s2924_s12  ;;  %38 = sbr.rel (!%p36_p2) target bundleno = 27 (0x1b), region = 173 }
 0x4cf   :  { %1379 = vsyncpa [#allocation3], 1 }
 0x4d0   :  { %1381 = vsyncpa [#allocation3 + $0x1], 1 }
 0x4d1   :  { %1382 = vsyncpa [#allocation6], 1 }
 0x4d2   :  { %1384 = vsyncpa [#allocation6 + $0x1], 1 }
 0x4d3   :  { %1385 = vsyncpa [#allocation9], 1 }
 0x4d4   :  { %1386 = vsyncpa [#allocation12], 1 }
 0x4d5   :  { %1387 = vsyncpa [#allocation15], 1 }
 0x4d6   :  { %1388 = vsyncpa [#allocation4], 1 }
 0x4d7   :  { %1390 = vsyncpa [#allocation4 + $0x1], 1 }

// kernel: tpu_custom_call.1
= control target key start
LH: loop header
LB: loop body
LE: loop exit
PB: predicated region body
PF: predicated region fallthrough
CT: control target
= control target key end

     0   :  { %s2838_s0 = inlined_call_operand.hbm [shape: f32[2,8,32], index: 0, kind: input, shape index: {}]   ;;  %s2839_s1 = inlined_call_operand.vmem [shape: f32[2,8,6], index: 1, kind: input, shape index: {}]   ;;  %s2840_s2 = inlined_call_operand.hbm [shape: f32[2,1,32], index: 2, kind: input, shape index: {}]   ;;  %s2841_s3 = inlined_call_operand.vmem [shape: f32[1,32], index: 3, kind: input, shape index: {}]   ;;  %s2842_s4 = inlined_call_operand.hbm [shape: f32[1,32], index: 4, kind: input, shape index: {}]   ;;  %s2843_s5 = inlined_call_operand.hbm [shape: f32[3,64], index: 5, kind: input, shape index: {}]   ;;  %s2844_s6 = inlined_call_operand.hbm [shape: f32[1,64], index: 6, kind: input, shape index: {}]   ;;  %s2845_s7 = inlined_call_operand.vmem [shape: f32[64,32], index: 7, kind: input, shape index: {}]   ;;  %s2846_s8 = inlined_call_operand.hbm [shape: f32[1,32], index: 8, kind: input, shape index: {}]   ;;  %s2847_s9 = inlined_call_operand.hbm [shape: f32[1,32], index: 9, kind: input, shape index: {}]   ;;  %s2848_s10 = inlined_call_operand.hbm [shape: f32[1,32], index: 10, kind: input, shape index: {}]   ;;  %s2849_s11 = inlined_call_operand.vmem [shape: f32[32,32], index: 11, kind: input, shape index: {}]   ;;  %s2850_s12 = inlined_call_operand.vmem [shape: f32[32,32], index: 12, kind: input, shape index: {}]   ;;  %s2851_s13 = inlined_call_operand.vmem [shape: f32[32,32], index: 13, kind: input, shape index: {}]   ;;  %s2852_s14 = inlined_call_operand.vmem [shape: f32[32,32], index: 14, kind: input, shape index: {}]   ;;  %s2853_s15 = inlined_call_operand.vmem [shape: f32[1,32], index: 15, kind: input, shape index: {}]   ;;  %s2854_s16 = inlined_call_operand.vmem [shape: f32[1,32], index: 16, kind: input, shape index: {}]   ;;  %s2855_s17 = inlined_call_operand.hbm [shape: f32[2,8,32], index: 17, kind: output, shape index: {}]  }
   0x1   :  { %2865 = sst [smem:[#allocation24_spill]] %s2838_s0 }
   0x2   :  { %2866 = sst [smem:[#allocation25_spill]] %s2839_s1 }
   0x3   :  { %2867 = sst [smem:[#allocation26_spill]] %s2841_s3 }
   0x4   :  { %2868 = sst [smem:[#allocation27_spill]] %s2842_s4 }
   0x5   :  { %2869 = sst [smem:[#allocation28_spill]] %s2843_s5 }
   0x6   :  { %2870 = sst [smem:[#allocation29_spill]] %s2844_s6 }
   0x7   :  { %2871 = sst [smem:[#allocation30_spill]] %s2846_s8 }
   0x8   :  { %2872 = sst [smem:[#allocation31_spill]] %s2847_s9 }
   0x9   :  { %2873 = sst [smem:[#allocation32_spill]] %s2848_s10 }
   0xa   :  { %2874 = sst [smem:[#allocation33_spill]] %s2850_s12 }
   0xb   :  { %2875 = sst [smem:[#allocation34_spill]] %s2851_s13 }
   0xc   :  { %2876 = sst [smem:[#allocation35_spill]] %s2852_s14 }
   0xd   :  { %2877 = sst [smem:[#allocation36_spill]] %s2853_s15 }
   0xe   :  { %2878 = sst [smem:[#allocation37_spill]] %s2854_s16 }
   0xf   :  { %2879 = sst [smem:[#allocation38_spill]] %s2855_s17 }
  0x10   :  { %22 = vsyncpa [#allocation3], 0 }
  0x11   :  { %24 = vsyncpa [#allocation3 + $0x1], 0 }
  0x12   :  { %25 = vsyncpa [#allocation6], 0 }
  0x13   :  { %27 = vsyncpa [#allocation6 + $0x1], 0 }
  0x14   :  { %28 = vsyncpa [#allocation9], 0 }
  0x15   :  { %29 = vsyncpa [#allocation12], 0 }
  0x16   :  { %30 = vsyncpa [#allocation15], 0 }
  0x17   :  { %31 = vsyncpa [#allocation4], 0 }
  0x18   :  { %33 = vsyncpa [#allocation4 + $0x1], 0  ;;  %s2332_s24 = smov 0   ;;  %s2334_s25 = smov 0  }
  0x19   :  { %s2336_s26 = smov 0   ;;  %s2338_s27 = smov 0  }
  0x1a   :  { %s2340_s28 = smov 0   ;;  %s2342_s29 = smov 0  }
  0x1b LB: > { %s2363_s0 = sadd.s32 4294967295, %s2222_s29   ;;  %p1535_p0 = scmp.ge.s32.totalorder %s2222_s29, 1  ;;  %s2222_s29 = sphi %s2342_s29, %s39_s29   ;;  %s2218_s28 = sphi %s2340_s28, %s2922_s28   ;;  %s2214_s27 = sphi %s2338_s27, %s2921_s27   ;;  %s2210_s26 = sphi %s2336_s26, %s2920_s26   ;;  %s2206_s25 = sphi %s2334_s25, %s2919_s25   ;;  %s2202_s24 = sphi %s2332_s24, %s2918_s24  }
  0x1c   : > { %p2860_p1 = scmp.eq.s32.totalorder %s2363_s0, 0  ;;  %p460_p2 = scmp.lt.s32.totalorder %s2222_s29, 3 }
  0x1d   : > { %s2224_s18 = smov [#allocation7]   ;;  %s2225_s1 = smov [#allocation8]  }
  0x1e   : > { %p2368_p3 = pnand %p1535_p0, %p460_p2  ;;  %s476_s19 = sshll.u32 %s2224_s18, 4  ;;  %s477_s19 = int_to_ptr.vmem [resolvable:$true] %s476_s19 }
  0x1f   : > { %s487_s20 = sshll.u32 %s2225_s1, 4  ;;  %s2226_s22 = smov [#allocation11]   ;;  %s2381_s20 = int_to_ptr.vmem [resolvable:$true] %s487_s20 }
  0x20   : > { %s2880_s30 = scalar_select %p2368_p3, 1, 0 }
  0x21   : > { %p1773_p5 = pneg %p2368_p3  ;;  %s512_s23 = sshll.u32 %s2226_s22, 4  ;;  %s2383_s23 = int_to_ptr.vmem [resolvable:$true] %s512_s23 }
  0x22   : > { %s2882_s4 = sld [smem:[#allocation27_spill]] }
  0x23   : > { %p2377_p6 = pnand %p1773_p5, %p2860_p1 }
  0x25   : > { %p2393_p8 = pneg %p2377_p6 }
  0x28   : > { %s1892_s16 = scalar_lea.hbm %s2882_s4, 16 }
  0x29   : > { %p1893_p7 = scmp.ne.s32.totalorder %s2882_s4, %s1892_s16  ;;  %p1899_p11 = scmp.lt.u32.totalorder %s1892_s16, %s2882_s4 }
  0x2b   : > { %p1895_p9 = pnand %p2393_p8, %p1893_p7 }
  0x2d   : > { %p1896_p10 = pneg %p1895_p9 }
  0x2f   : > { %p1901_p12 = pnand %p1899_p11, %p1896_p10 }
  0x31   : > { %1904 = shalt.err (!%p1901_p12)
}
  0x32   : > { %s1905_s17 = scalar_lea.vmem %s477_s19, 16  ;;  %s1912_s14 = scalar_lea.vmem %s477_s19, 32 }
  0x33   : > { %p1906_p13 = scmp.ne.s32.totalorder %s477_s19, %s1905_s17  ;;  %p1913_p5 = scmp.lt.s32.totalorder %s477_s19, %s477_s19 }
  0x34   : > { %p1914_p4 = scmp.lt.s32.totalorder %s1912_s14, %s1905_s17 }
  0x35   : > { %p1908_p0 = pnand %p1906_p13, %p2393_p8 }
  0x36   : > { %p1915_p1 = por %p1914_p4, %p1913_p5 }
  0x37   : > { %p1909_p2 = pneg %p1908_p0 }
  0x39   : > { %p1916_p3 = pnand %p1915_p1, %p1909_p2 }
  0x3b   : > { %1919 = shalt.err (!%p1916_p3)
}
  0x3c   : > { %1776 = dma.hbm_to_vmem [thread:$0]  (!%p2377_p6), %s2882_s4, 16, %s477_s19, [#allocation6]  }
  0x3d   : > { %s2884_s5 = sld [smem:[#allocation28_spill]] }
  0x43   : > { %s1920_s22 = scalar_lea.hbm %s2884_s5, 64 }
  0x44   : > { %p1921_p7 = scmp.ne.s32.totalorder %s2884_s5, %s1920_s22  ;;  %p1927_p1 = scmp.lt.u32.totalorder %s1920_s22, %s2884_s5 }
  0x46   : > { %p1923_p9 = pnand %p1921_p7, %p2393_p8 }
  0x48   : > { %p1924_p4 = pneg %p1923_p9 }
  0x4a   : > { %p1929_p3 = pnand %p1927_p1, %p1924_p4 }
  0x4c   : > { %1932 = shalt.err (!%p1929_p3)
}
  0x4d   : > { %s1933_s19 = scalar_lea.vmem %s2381_s20, 64  ;;  %p1941_p13 = scmp.lt.s32.totalorder %s2381_s20, %s2381_s20 }
  0x4e   : > { %p1934_p10 = scmp.ne.s32.totalorder %s2381_s20, %s1933_s19  ;;  %p1942_p0 = scmp.lt.s32.totalorder %s1933_s19, %s1933_s19 }
  0x50   : > { %p1936_p11 = pnand %p1934_p10, %p2393_p8  ;;  %p1943_p2 = por %p1942_p0, %p1941_p13 }
  0x52   : > { %p1937_p12 = pneg %p1936_p11 }
  0x54   : > { %p1944_p5 = pnand %p1943_p2, %p1937_p12 }
  0x56   : > { %1947 = shalt.err (!%p1944_p5)
}
  0x57   : > { %1779 = dma.hbm_to_vmem [thread:$0]  (!%p2377_p6), %s2884_s5, 64, %s2381_s20, [#allocation9]  }
  0x58   : > { %s2885_s8 = sld [smem:[#allocation30_spill]] }
  0x5e   : > { %s1948_s12 = scalar_lea.hbm %s2885_s8, 16 }
  0x5f   : > { %p1949_p7 = scmp.ne.s32.totalorder %s2885_s8, %s1948_s12  ;;  %p1955_p1 = scmp.lt.u32.totalorder %s1948_s12, %s2885_s8 }
  0x61   : > { %p1951_p9 = pnand %p1949_p7, %p2393_p8 }
  0x63   : > { %p1952_p4 = pneg %p1951_p9 }
  0x65   : > { %p1957_p3 = pnand %p1955_p1, %p1952_p4 }
  0x67   : > { %1960 = shalt.err (!%p1957_p3)
}
  0x68   : > { %s1961_s20 = scalar_lea.vmem %s2383_s23, 16  ;;  %s1968_s19 = scalar_lea.vmem %s2383_s23, 32 }
  0x69   : > { %p1962_p10 = scmp.ne.s32.totalorder %s2383_s23, %s1961_s20  ;;  %p1969_p13 = scmp.lt.s32.totalorder %s2383_s23, %s2383_s23 }
  0x6a   : > { %p1970_p0 = scmp.lt.s32.totalorder %s1968_s19, %s1961_s20 }
  0x6b   : > { %p1964_p11 = pnand %p1962_p10, %p2393_p8 }
  0x6c   : > { %p1971_p2 = por %p1970_p0, %p1969_p13 }
  0x6d   : > { %p1965_p12 = pneg %p1964_p11 }
  0x6f   : > { %p1972_p5 = pnand %p1971_p2, %p1965_p12 }
  0x71   : > { %1975 = shalt.err (!%p1972_p5)
}
  0x72   : > { %1785 = dma.hbm_to_vmem [thread:$0]  (!%p2377_p6), %s2885_s8, 16, %s2383_s23, [#allocation12]  }
  0x73   : > { %s2227_s15 = smov [#allocation10]   ;;  %s2228_s12 = smov [#allocation13]  }
  0x74   : > { %s498_s18 = sshll.u32 %s2227_s15, 4  ;;  %s523_s16 = sshll.u32 %s2228_s12, 4  ;;  %s499_s18 = int_to_ptr.vmem [resolvable:$true] %s498_s18  ;;  %s524_s16 = int_to_ptr.vmem [resolvable:$true] %s523_s16 }
  0x75   : > { %s2886_s6 = sld [smem:[#allocation29_spill]] }
  0x7b   : > { %s1976_s14 = scalar_lea.hbm %s2886_s6, 16 }
  0x7c   : > { %p1977_p7 = scmp.ne.s32.totalorder %s2886_s6, %s1976_s14  ;;  %p1983_p1 = scmp.lt.u32.totalorder %s1976_s14, %s2886_s6 }
  0x7e   : > { %p1979_p9 = pnand %p1977_p7, %p2393_p8 }
  0x80   : > { %p1980_p4 = pneg %p1979_p9 }
  0x82   : > { %p1985_p3 = pnand %p1983_p1, %p1980_p4 }
  0x84   : > { %1988 = shalt.err (!%p1985_p3)
}
  0x85   : > { %s1989_s23 = scalar_lea.vmem %s499_s18, 16  ;;  %s1996_s13 = scalar_lea.vmem %s499_s18, 32 }
  0x86   : > { %p1990_p10 = scmp.ne.s32.totalorder %s499_s18, %s1989_s23  ;;  %p1997_p13 = scmp.lt.s32.totalorder %s499_s18, %s499_s18 }
  0x87   : > { %p1998_p0 = scmp.lt.s32.totalorder %s1996_s13, %s1989_s23 }
  0x88   : > { %p1992_p11 = pnand %p1990_p10, %p2393_p8 }
  0x89   : > { %p1999_p2 = por %p1998_p0, %p1997_p13 }
  0x8a   : > { %p1993_p12 = pneg %p1992_p11 }
  0x8c   : > { %p2000_p5 = pnand %p1999_p2, %p1993_p12 }
  0x8e   : > { %2003 = shalt.err (!%p2000_p5)
}
  0x8f   : > { %1782 = dma.hbm_to_vmem [thread:$0]  (!%p2377_p6), %s2886_s6, 16, %s499_s18, [#allocation9]  }
  0x90   : > { %s2887_s9 = sld [smem:[#allocation31_spill]] }
  0x96   : > { %s2004_s17 = scalar_lea.hbm %s2887_s9, 16 }
  0x97   : > { %p2005_p7 = scmp.ne.s32.totalorder %s2887_s9, %s2004_s17  ;;  %p2011_p1 = scmp.lt.u32.totalorder %s2004_s17, %s2887_s9 }
  0x99   : > { %p2007_p9 = pnand %p2005_p7, %p2393_p8 }
  0x9b   : > { %p2008_p4 = pneg %p2007_p9 }
  0x9d   : > { %p2013_p3 = pnand %p2011_p1, %p2008_p4 }
  0x9f   : > { %2016 = shalt.err (!%p2013_p3)
}
  0xa0   : > { %s2017_s23 = scalar_lea.vmem %s524_s16, 16  ;;  %s2024_s18 = scalar_lea.vmem %s524_s16, 32 }
  0xa1   : > { %p2018_p10 = scmp.ne.s32.totalorder %s524_s16, %s2017_s23  ;;  %p2025_p13 = scmp.lt.s32.totalorder %s524_s16, %s524_s16 }
  0xa2   : > { %p2026_p0 = scmp.lt.s32.totalorder %s2024_s18, %s2017_s23 }
  0xa3   : > { %p2020_p11 = pnand %p2018_p10, %p2393_p8 }
  0xa4   : > { %p2027_p2 = por %p2026_p0, %p2025_p13 }
  0xa5   : > { %p2021_p12 = pneg %p2020_p11 }
  0xa7   : > { %p2028_p5 = pnand %p2027_p2, %p2021_p12 }
  0xa9   : > { %2031 = shalt.err (!%p2028_p5)
}
  0xaa   : > { %1788 = dma.hbm_to_vmem [thread:$0]  (!%p2377_p6), %s2887_s9, 16, %s524_s16, [#allocation12]  }
  0xab   : > { %s2229_s12 = smov [#allocation14]   ;;  %s2888_s10 = sld [smem:[#allocation32_spill]] }
  0xac   : > { %s534_s4 = sshll.u32 %s2229_s12, 4  ;;  %s535_s4 = int_to_ptr.vmem [resolvable:$true] %s534_s4 }
  0xb1   : > { %s2032_s14 = scalar_lea.hbm %s2888_s10, 16 }
  0xb2   : > { %p2033_p7 = scmp.ne.s32.totalorder %s2888_s10, %s2032_s14  ;;  %p2039_p1 = scmp.lt.u32.totalorder %s2032_s14, %s2888_s10 }
  0xb4   : > { %p2035_p9 = pnand %p2033_p7, %p2393_p8 }
  0xb6   : > { %p2036_p4 = pneg %p2035_p9 }
  0xb8   : > { %p2041_p3 = pnand %p2039_p1, %p2036_p4 }
  0xba   : > { %2044 = shalt.err (!%p2041_p3)
}
  0xbb   : > { %s2045_s16 = scalar_lea.vmem %s535_s4, 16  ;;  %s2052_s18 = scalar_lea.vmem %s535_s4, 32 }
  0xbc   : > { %p2046_p10 = scmp.ne.s32.totalorder %s535_s4, %s2045_s16  ;;  %p2053_p13 = scmp.lt.s32.totalorder %s535_s4, %s535_s4 }
  0xbd   : > { %p2054_p0 = scmp.lt.s32.totalorder %s2052_s18, %s2045_s16 }
  0xbe   : > { %p2048_p11 = pnand %p2046_p10, %p2393_p8 }
  0xbf   : > { %p2055_p2 = por %p2054_p0, %p2053_p13 }
  0xc0   : > { %p2049_p12 = pneg %p2048_p11 }
  0xc2   : > { %p2056_p5 = pnand %p2055_p2, %p2049_p12 }
  0xc4   : > { %2059 = shalt.err (!%p2056_p5)
}
  0xc5   : > { %1791 = dma.hbm_to_vmem [thread:$0]  (!%p2377_p6), %s2888_s10, 16, %s535_s4, [#allocation15]  }
  0xc6   : > { %s1534_s1 = sadd.s32 4294967294, %s2222_s29   ;;  %s51_s12 = sadd.s32 1, %s2218_s28 }
  0xc7   : > { %p53_p8 = scmp.ge.s32.totalorder %s51_s12, 2  ;;  %s60_s21 = sadd.s32 1, %s2210_s26 }
  0xc8   : > { %p67_p7 = scmp.ne.s32.totalorder %s2210_s26, %s2206_s25  ;;  %p68_p9 = scmp.eq.s32.totalorder %s2222_s29, 0 }
  0xc9   : > { %s2924_s12 = smov (%p53_p8, %s51_s12), 0  ;;  %p73_p1 = scmp.ne.s32.totalorder %s2206_s25, %s2202_s24 }
  0xca   : > { %p2518_p4 = por %p68_p9, %p67_p7  ;;  %s55_s4 = ssub.s32 %s2218_s28, %s2924_s12 }
  0xcb   : > { %p447_p6 = scmp.eq.s32.totalorder %s2363_s0, 1  ;;  %p58_p3 = scmp.eq.s32.totalorder %s55_s4, 0 }
  0xcc   : > { %p2890_p10 = scmp.eq.s32.totalorder %s2363_s0, 0  ;;  %p453_p13 = scmp.eq.s32.totalorder %s1534_s1, 1 }
  0xcd   : > { %p2533_p12 = por %p447_p6, %p67_p7  ;;  %p1809_p2 = scmp.lt.s32.totalorder %s2222_s29, 2 }
  0xce   : > { %p2529_p11 = por %p2890_p10, %p73_p1  ;;  %p2540_p0 = por %p453_p13, %p73_p1 }
  0xcf   : > { %s2892_s14 = scalar_select %p2533_p12, 1, 0 }
  0xd0   : > { %s2891_s17 = scalar_select %p2529_p11, 1, 0 }
  0xd1   : > { %s2538_s20 = scalar_select %p58_p3, %s2210_s26, %s60_s21  }
  0xd2   : > { %s2893_s19 = scalar_select %p2540_p0, 1, 0 }
  0xd3   : > { %s2546_s3 = sand.u32 1, %s2210_s26   ;;  %s1544_s23 = sshll.u32 %s2218_s28, 7 }
  0xd4   : > { %s1543_s16 = sshll.u32 %s2546_s3, 3  ;;  %s2894_s15 = sld [smem:[#allocation24_spill]] }
  0xd5   : > { %s567_s1 = scalar_lea.vmem [#allocation2], %s1543_s16  ;;  %p2557_p5 = pnand %p1809_p2, %p2518_p4 }
  0xd6   : > { %s575_s21 = sshll.u32 %s567_s1, 4  ;;  %s564_s8 = scalar_lea.sflag [#allocation3], %s2546_s3  ;;  %s2561_s21 = int_to_ptr.vmem [resolvable:$true] %s575_s21 }
  0xd7   : > { %p2062_p7 = pneg %p2557_p5 }
  0xda   : > { %s2553_s4 = scalar_lea.hbm %s2894_s15, %s1544_s23  ;;  %s2065_s16 = scalar_lea.hbm %s2894_s15, 256 }
  0xdb   : > { %s2060_s18 = scalar_lea.hbm %s2553_s4, 128  ;;  %p2066_p4 = scmp.lt.u32.totalorder %s2553_s4, %s2894_s15 }
  0xdc   : > { %p2061_p8 = scmp.ne.s32.totalorder %s2553_s4, %s2060_s18  ;;  %p2067_p6 = scmp.lt.u32.totalorder %s2065_s16, %s2060_s18 }
  0xdd   : > { %p2069_p10 = scmp.lt.u32.totalorder %s2060_s18, %s2553_s4 }
  0xde   : > { %p2063_p9 = pnand %p2062_p7, %p2061_p8  ;;  %p2068_p3 = por %p2067_p6, %p2066_p4 }
  0xe0   : > { %p2064_p1 = pneg %p2063_p9  ;;  %p2070_p13 = por %p2069_p10, %p2068_p3 }
  0xe2   : > { %p2071_p2 = pnand %p2070_p13, %p2064_p1 }
  0xe4   : > { %2074 = shalt.err (!%p2071_p2)
}
  0xe5   : > { %s2075_s6 = scalar_lea.vmem %s2561_s21, 128  ;;  %s2230_s23 = smov [#allocation2]  }
  0xe6   : > { %p2076_p8 = scmp.ne.s32.totalorder %s2561_s21, %s2075_s6  ;;  %s2080_s22 = sshll.u32 %s2230_s23, 4  ;;  %s2081_s22 = int_to_ptr.vmem [resolvable:$false] %s2080_s22 }
  0xe7   : > { %s2082_s13 = scalar_lea.vmem %s2081_s22, 256  ;;  %p2083_p12 = scmp.lt.s32.totalorder %s2561_s21, %s2081_s22 }
  0xe8   : > { %p2078_p9 = pnand %p2076_p8, %p2062_p7  ;;  %p2084_p4 = scmp.lt.s32.totalorder %s2082_s13, %s2075_s6 }
  0xea   : > { %p2079_p0 = pneg %p2078_p9  ;;  %p2085_p6 = por %p2084_p4, %p2083_p12 }
  0xec   : > { %p2086_p3 = pnand %p2085_p6, %p2079_p0 }
  0xee   : > { %2089 = shalt.err (!%p2086_p3)
}
  0xef   : > { %1795 = dma.hbm_to_vmem [thread:$0]  (!%p2557_p5), %s2553_s4, 128, %s2561_s21, %s564_s8  }
  0xf0   : > { %s1545_s18 = sshll.u32 %s2218_s28, 4  ;;  %s595_s6 = scalar_lea.vmem [#allocation5], %s2546_s3 }
  0xf1   : > { %s2594_s23 = scalar_lea.hbm %s2840_s2, %s1545_s18  ;;  %s602_s22 = sshll.u32 %s595_s6, 4  ;;  %s603_s22 = int_to_ptr.vmem [resolvable:$true] %s602_s22 }
  0xf2   : > { %s2896_s13 = sand.u32 1, %s2222_s29   ;;  %s2090_s10 = scalar_lea.hbm %s2594_s23, 16 }
  0xf3   : > { %s593_s9 = scalar_lea.sflag [#allocation6], %s2896_s13  ;;  %p2091_p12 = scmp.ne.s32.totalorder %s2594_s23, %s2090_s10 }
  0xf4   : > { %s2095_s21 = scalar_lea.hbm %s2840_s2, 32  ;;  %p2096_p10 = scmp.lt.u32.totalorder %s2594_s23, %s2840_s2 }
  0xf5   : > { %p2093_p0 = pnand %p2091_p12, %p2062_p7  ;;  %p2097_p13 = scmp.lt.u32.totalorder %s2095_s21, %s2090_s10 }
  0xf6   : > { %p2099_p8 = scmp.lt.u32.totalorder %s2090_s10, %s2594_s23 }
  0xf7   : > { %p2094_p1 = pneg %p2093_p0  ;;  %p2098_p2 = por %p2097_p13, %p2096_p10 }
  0xf9   : > { %p2100_p9 = por %p2099_p8, %p2098_p2 }
  0xfb   : > { %p2101_p4 = pnand %p2100_p9, %p2094_p1 }
  0xfd   : > { %2104 = shalt.err (!%p2101_p4)
}
  0xfe   : > { %s2105_s3 = scalar_lea.vmem %s603_s22, 16  ;;  %s2231_s1 = smov [#allocation5]  }
  0xff   : > { %p2106_p6 = scmp.ne.s32.totalorder %s603_s22, %s2105_s3  ;;  %s2110_s6 = sshll.u32 %s2231_s1, 4  ;;  %s2111_s6 = int_to_ptr.vmem [resolvable:$false] %s2110_s6 }
 0x100   : > { %s2112_s13 = scalar_lea.vmem %s2111_s6, 32  ;;  %p2113_p0 = scmp.lt.s32.totalorder %s603_s22, %s2111_s6 }
 0x101   : > { %p2108_p3 = pnand %p2106_p6, %p2062_p7  ;;  %p2114_p11 = scmp.lt.s32.totalorder %s2112_s13, %s2105_s3 }
 0x103   : > { %p2109_p12 = pneg %p2108_p3  ;;  %p2115_p10 = por %p2114_p11, %p2113_p0 }
 0x105   : > { %p2116_p13 = pnand %p2115_p10, %p2109_p12 }
 0x107   : > { %2119 = shalt.err (!%p2116_p13)
}
 0x108   : > { %1798 = dma.hbm_to_vmem [thread:$0]  (!%p2557_p5), %s2594_s23, 16, %s603_s22, %s593_s9  }
 0x109   : > { %p2897_p1 = scmp.ne.s32.totalorder %s2880_s30, 0 }
 0x10a   : > { %s2621_s10 = sand.u32 (!%p2897_p1), 1, %s2206_s25   ;;  %p2898_p11 = scmp.ne.s32.totalorder (!%p2897_p1), %s2891_s17, 0 }
 0x10b   : > { %611 = sbr.rel (%p2897_p1) target bundleno = 1215 (0x4bf), region = 88  ;;  %s1547_s8 = sshll.u32 (!%p2897_p1), %s2621_s10, 3 }
 0x10c   : > { %s614_s4 = scalar_lea.sflag (!%p2897_p1), [#allocation3], %s2621_s10  ;;  %s2627_s21 = scalar_lea.vmem (!%p2897_p1), [#allocation2], %s1547_s8 }
 0x112   : > { %2173 = dma.done.wait (%p2898_p11), %s614_s4, 128  }
 0x113   : > { %2175 = vsyncadd (%p2898_p11), %s614_s4, 4294967168  ;;  %s622_s5 = sand.u32 1, %s2363_s0   ;;  %s625_s30 = scalar_lea.vmem [#allocation5], %s2621_s10 }
 0x114   : > { %s623_s9 = scalar_lea.sflag [#allocation6], %s622_s5 }
 0x115   : > { %2177 = dma.done.wait (%p2898_p11), %s623_s9, 16  }
 0x116   : > { %2179 = vsyncadd (%p2898_p11), %s623_s9, 4294967280  ;;  %p2899_p5 = scmp.eq.s32.totalorder %s2363_s0, 0 }
 0x118   : > { %2181 = dma.done.wait (%p2899_p5), [#allocation6], 16   ;;  %p2900_p7 = pmov %p2899_p5 }
 0x119   : > { %p2901_p2 = pmov %p2899_p5 }
 0x11a   : > { %2183 = vsyncadd (%p2900_p7), [#allocation6], 4294967280 }
 0x11b   : > { %2185 = dma.done.wait (%p2901_p2), [#allocation9], 80   ;;  %p2902_p8 = pmov %p2901_p2 }
 0x11c   : > { %p2903_p9 = pmov %p2901_p2 }
 0x11d   : > { %2187 = vsyncadd (%p2902_p8), [#allocation9], 4294967216 }
 0x11e   : > { %2189 = dma.done.wait (%p2903_p9), [#allocation12], 32   ;;  %p2904_p4 = pmov %p2901_p2 }
 0x11f   : > { %p2905_p6 = pmov %p2901_p2 }
 0x120   : > { %2191 = vsyncadd (%p2904_p4), [#allocation12], 4294967264 }
 0x121   : > { %2193 = dma.done.wait (%p2905_p6), [#allocation15], 16   ;;  %p2906_p3 = pmov %p2901_p2 }
 0x122   : > { %p711_p12 = scmp.lt.s32.totalorder %s2214_s27, 1  ;;  %v2232_v0 = vmov 2   ;;  %v2233_v1 = vmov 0   ;;  %v2234_v2 = vmov 0.0|0.0   ;;  %s2907_s16 = sld [smem:[#allocation25_spill]]  ;;  %v752_v4 = vld [vmem:[%s2845_s7] sm:$0xff]  ;;  %v766_v21 = vlaneseq }
 0x123   : > { %2195 = vsyncadd (%p2906_p3), [#allocation15], 4294967280  ;;  %1882 = vset.pattern.permute.xlu1 %v2232_v0  ;;  %1880 = vset.pattern.permute.xlu0 %v2233_v1  ;;  %v753_v5 = vld [vmem:[%s2845_s7 + $0x8] sm:$0xff]  ;;  %v754_v6 = vld [vmem:[%s2845_s7 + $0x10] sm:$0xff]  ;;  %v2235_v10 = vmov 3   ;;  %v2236_v11 = vmov 1  }
 0x124   : > { %s712_s17 = scalar_select %p711_p12, %s2214_s27, 1  ;;  %1695 = vmatprep.subr.bf16.mxu0 %v2234_v2  ;;  %1707 = vmatprep.subr.bf16.mxu1 %v2234_v2  ;;  %v755_v7 = vld [vmem:[%s2845_s7 + $0x18] sm:$0xff]  ;;  %v1696_v8 = vpack.c.bf16 %v753_v5, %v752_v4  ;;  %v756_v12 = vld [vmem:[%s2845_s7 + $0x20] sm:$0xff]  ;;  %v757_v13 = vld [vmem:[%s2845_s7 + $0x28] sm:$0xff]  ;;  %v2237_v15 = vmov 4   ;;  %v2238_v16 = vmov 5  }
 0x125   : > { %v1699_v9 = vpack.c.bf16 %v755_v7, %v754_v6  ;;  %v1702_v14 = vpack.c.bf16 %v757_v13, %v756_v12  ;;  %v758_v17 = vld [vmem:[%s2845_s7 + $0x30] sm:$0xff]  ;;  %v759_v18 = vld [vmem:[%s2845_s7 + $0x38] sm:$0xff]  ;;  %vm2239_vm0 = vmmov 0   ;;  %v2240_v20 = vmov 0.0   ;;  %v718_v55 = vld [vmem:[%s2627_s21] sm:$0xff]  ;;  %s2911_s21 = sld [smem:[#allocation35_spill]] }
 0x126   : > { %s1555_s23 = sshll.u32 %s712_s17, 3  ;;  %1697 = vmatpush3.bf16.msra.mxu0 %v1696_v8  ;;  %1709 = vmatpush3.bf16.msra.mxu1 %v1696_v8  ;;  %v1705_v19 = vpack.c.bf16 %v759_v18, %v758_v17  ;;  %v767_v22 = vshrl.u32 %v766_v21, 7  ;;  %v751_v28 = vld [vmem:[#allocation8] sm:$0x7]  ;;  %v1558_v38 = vld [vmem:[#allocation10] ss:$0 sm:$0xff] }
 0x127   : > { %1698 = vmatprep.subr.bf16.mxu0 %v2234_v2  ;;  %1710 = vmatprep.subr.bf16.mxu1 %v2234_v2  ;;  %vm807_vm1 = vcmask 523264   ;;  %v1559_v51 = vld [vmem:[#allocation11] ss:$0 sm:$0xff]  ;;  %vm719_vm2 = vcmask 261120   ;;  %v1027_v21 = vld [vmem:[%s2849_s11 + $0x10] sm:$0xff]  ;;  %s2909_s17 = sld [smem:[#allocation26_spill]] }
 0x128   : > { %s717_s3 = scalar_lea.vmem %s2907_s16, %s1555_s23  ;;  %1629 = vmatprep.mubr.msk.f32.mxu0 %vm2239_vm0, %v2240_v20  ;;  %1648 = vmatprep.mubr.msk.f32.mxu1 %vm2239_vm0, %v2240_v20  ;;  %v768_v23 = vsub.s32 0, %v767_v22  ;;  %v777_v24 = vsub.s32 1, %v767_v22  ;;  %v787_v25 = vsub.s32 2, %v767_v22  ;;  %v720_v58 = vsel %vm719_vm2, %v718_v55, 0.0  ;;  %s2908_s23 = sld [smem:[#allocation34_spill]]  ;;  %v1028_v22 = vld [vmem:[%s2849_s11 + $0x18] sm:$0xff] }
 0x129   : > { %v750_v3 = vld [vmem:[%s717_s3] sm:$0xff]  ;;  %s2910_s16 = sld [smem:[#allocation33_spill]]  ;;  %s2912_s13 = sld [smem:[#allocation36_spill]] }
 0x12a   : > { %782 = vperm.xlu1 %1882, %v750_v3   ;;  %763 = vperm.xlu0 %1880, %v750_v3   ;;  %v769_v29 = vrot.slane %v751_v28, %v768_v23  ;;  %v778_v30 = vrot.slane %v751_v28, %v777_v24  ;;  %v788_v31 = vrot.slane %v751_v28, %v787_v25  ;;  %s2913_s9 = sld [smem:[#allocation37_spill]]  ;;  %s710_s22 = scalar_lea.vmem [#allocation16], %s1547_s8 }
 0x12b   : > { %1700 = vmatpush3.bf16.msra.mxu0 %v1699_v9  ;;  %1712 = vmatpush3.bf16.msra.mxu1 %v1699_v9  ;;  %v1729_v23 = vpack.c.bf16 %v1028_v22, %v1027_v21  ;;  %s2914_s0 = sld [smem:[#allocation38_spill]]  ;;  %s1347_s6 = scalar_lea.sflag [#allocation4], %s2621_s10 }
 0x12c   : > { %1701 = vmatprep.subr.bf16.mxu0 %v2234_v2  ;;  %1713 = vmatprep.subr.bf16.mxu1 %v2234_v2  ;;  %p2915_p10 = scmp.ne.s32.totalorder %s2892_s14, 0  ;;  %s2241_s8 = smov [#allocation16]  }
 0x12e   : > { %1883 = vset.pattern.permute.xlu1 %v2235_v10  ;;  %1881 = vset.pattern.permute.xlu0 %v2236_v11  ;;  %v1029_v17 = vld [vmem:[%s2908_s23] sm:$0xff]  ;;  %v1030_v18 = vld [vmem:[%s2908_s23 + $0x8] sm:$0xff]  ;;  %v1031_v24 = vld [vmem:[%s2908_s23 + $0x10] sm:$0xff] }
 0x12f   : > { %918 = vperm.xlu1 %1883, %v750_v3   ;;  %772 = vperm.xlu0 %1881, %v750_v3   ;;  %v1032_v25 = vld [vmem:[%s2908_s23 + $0x18] sm:$0xff] }
 0x130   : > { %1703 = vmatpush3.bf16.msra.mxu0 %v1702_v14  ;;  %1715 = vmatpush3.bf16.msra.mxu1 %v1702_v14  ;;  %v1025_v14 = vld [vmem:[%s2849_s11] sm:$0xff] }
 0x131   : > { %1704 = vmatprep.subr.bf16.mxu0 %v2234_v2  ;;  %1716 = vmatprep.subr.bf16.mxu1 %v2234_v2 }
 0x133   : > { %1884 = vset.pattern.permute.xlu1 %v2237_v15  ;;  %1885 = vset.pattern.permute.xlu0 %v2238_v16  ;;  %v1026_v15 = vld [vmem:[%s2849_s11 + $0x8] sm:$0xff] }
 0x134   : > { %923 = vperm.xlu1 %1884, %v750_v3   ;;  %929 = vperm.xlu0 %1885, %v750_v3   ;;  %v1726_v16 = vpack.c.bf16 %v1026_v15, %v1025_v14 }
 0x135   : > { %1706 = vmatpush3.bf16.msra.mxu0 %v1705_v19  ;;  %1718 = vmatpush3.bf16.msra.mxu1 %v1705_v19  ;;  %v1720_v19 = vpack.c.bf16 %v1030_v18, %v1029_v17 }
 0x136   : > { %1725 = vmatprep.subr.bf16.mxu1 %v2234_v2  ;;  %1719 = vmatprep.subr.bf16.mxu0 %v2234_v2 }
 0x1a9   : > { %v783_v26 = vpop.permute.xlu1 %782  ;;  %v764_v27 = vpop.permute.xlu0 %763 }
 0x1aa   : > { %v770_v34 = vmul.f32 %v769_v29, %v764_v27  ;;  %v789_v36 = vmul.f32 %v788_v31, %v783_v26  ;;  %v1723_v26 = vpack.c.bf16 %v1032_v25, %v1031_v24 }
 0x1ae   : > { %v919_v32 = vpop.permute.xlu1 %918  ;;  %v773_v33 = vpop.permute.xlu0 %772 }
 0x1af   : > { %v779_v35 = vmul.f32 %v778_v30, %v773_v33  ;;  %v921_v42 = vmul.f32 %v919_v32, %v769_v29 }
 0x1b1   : > { %v780_v37 = vadd.f32 %v779_v35, %v770_v34 }
 0x1b3   : > { %v790_v39 = vadd.f32 %v789_v36, %v780_v37  ;;  %v924_v40 = vpop.permute.xlu1 %923  ;;  %v930_v41 = vpop.permute.xlu0 %929  ;;  %v1561_v37 = vld [vmem:[#allocation13] ss:$0 sm:$0xff] }
 0x1b4   : > { %v926_v43 = vmul.f32 %v924_v40, %v778_v30  ;;  %v932_v44 = vmul.f32 %v930_v41, %v788_v31  ;;  %v1562_v40 = vld [vmem:[#allocation14] ss:$0 sm:$0xff] }
 0x1b5   : > { %v798_v45 = vadd.f32 %v1558_v38, %v790_v39 }
 0x1b6   : > { %v927_v46 = vadd.f32 %v926_v43, %v921_v42  ;;  %v1556_v42 = vld [vmem:[%s2909_s17] ss:$0 sm:$0xff]  ;;  %s1572_s17 = sshll.u32 %s2214_s27, 7 }
 0x1b7   : > { %v799_v47 = vmax.f32 %v798_v45, 0.0  ;;  %v1187_v45 = vld [vmem:[%s2910_s16] sm:$0xff]  ;;  %s2788_s1 = scalar_lea.hbm %s2914_s0, %s1572_s17 }
 0x1b8   : > { %v933_v48 = vadd.f32 %v932_v44, %v927_v46  ;;  %v1188_v46 = vld [vmem:[%s2910_s16 + $0x8] sm:$0xff] }
 0x1b9   : > { %1630 = vmatmul.mubr.msk.f32.vlgmr.msra.gmra.mrb[0].mxu0 %vm807_vm1, %v799_v47 }
 0x1ba   : > { %v934_v49 = vadd.f32 %v1558_v38, %v933_v48  ;;  %1659 = vmatprep.mubr.msk.f32.mxu0 %vm2239_vm0, %v2240_v20  ;;  %1721 = vmatpush3.bf16.msra.mxu0 %v1720_v19  ;;  %v1557_v48 = vld [vmem:[#allocation7] ss:$0 sm:$0xff] }
 0x1bb   : > { %1722 = vmatprep.subr.bf16.mxu0 %v2234_v2 }
 0x1bc   : > { %v935_v50 = vmax.f32 %v934_v49, 0.0 }
 0x1be   : > { %1649 = vmatmul.mubr.msk.f32.vlgmr.msra.gmra.mrb[0].mxu1 %vm807_vm1, %v935_v50  ;;  %1724 = vmatpush3.bf16.msra.mxu0 %v1723_v26 }
 0x1bf   : > { %1670 = vmatprep.mubr.msk.f32.mxu1 %vm2239_vm0, %v2240_v20  ;;  %1727 = vmatpush3.bf16.msra.mxu1 %v1726_v16 }
 0x1c0   : > { %1728 = vmatprep.subr.bf16.mxu1 %v2234_v2  ;;  %1731 = vmatprep.subr.bf16.mxu0 %v2234_v2 }
 0x1c3   : > { %1730 = vmatpush3.bf16.msra.mxu1 %v1729_v23 }
 0x1c4   : > { %1737 = vmatprep.subr.bf16.mxu1 %v2234_v2 }
 0x28c   : > { %v877_v52 = vpop.f32.mrb[0].mxu0 }
 0x28d   : > { %v878_v53 = vadd.f32 %v1559_v51, %v877_v52  ;;  %v1631_v54 = vpop.f32.mrb[1].mxu0 }
 0x28e   : > { %v1191_v54 = vld [vmem:[%s2911_s21] sm:$0xff] }
 0x28f   : > { %v881_v56 = vsel %vm719_vm2, %v878_v53, 0.0 }
 0x290   : > { %882 = vadd.xlane.f32.xlu1 %v881_v56 }
 0x291   : > { %v1005_v57 = vpop.f32.mrb[0].mxu1 }
 0x292   : > { %v1006_v59 = vadd.f32 %v1559_v51, %v1005_v57  ;;  %v1650_v60 = vpop.f32.mrb[1].mxu1  ;;  %v1563_v51 = vld [vmem:[%s625_s30] ss:$0 sm:$0xff]  ;;  %v1189_v57 = vld [vmem:[%s2910_s16 + $0x10] sm:$0xff]  ;;  %s1361_s30 = sshll.u32 %s710_s22, 4  ;;  %s2790_s30 = int_to_ptr.vmem [resolvable:$true] %s1361_s30 }
 0x293   : > { %s2120_s27 = scalar_lea.vmem %s2790_s30, 128 }
 0x294   : > { %721 = vadd.xlane.f32.xlu1 %v720_v58  ;;  %v1009_v61 = vsel %vm719_vm2, %v1006_v59, 0.0  ;;  %v1190_v58 = vld [vmem:[%s2910_s16 + $0x18] sm:$0xff]  ;;  %p2121_p0 = scmp.ne.s32.totalorder %s2790_s30, %s2120_s27 }
 0x295   : > { %1010 = vadd.xlane.f32.xlu0 %v1009_v61 }
 0x296   : > { %p2122_p13 = pnand %p2121_p0, %p2915_p10 }
 0x298   : > { %p2123_p1 = pneg %p2122_p13 }
 0x31d   : > { %v883_v62 = vpop.xlane.xlu1 %882 }
 0x31e   : > { %v884_v63 = vmul.f32 0.03125, %v883_v62 }
 0x320   : > { %v885_v0 = vsub.f32 %v878_v53, %v884_v63  ;;  %v1738_v53 = vpack.c.bf16 %v1188_v46, %v1187_v45  ;;  %v1741_v63 = vpack.c.bf16 %v1190_v58, %v1189_v57 }
 0x321   : > { %v722_v1 = vpop.xlane.xlu1 %721 }
 0x322   : > { %v724_v3 = vmul.f32 0.03125, %v722_v1  ;;  %v1011_v4 = vpop.xlane.xlu0 %1010  ;;  %v886_v5 = vmul.f32 %v885_v0, %v885_v0  ;;  %v1194_v1 = vld [vmem:[%s2911_s21 + $0x18] sm:$0xff] }
 0x323   : > { %v1012_v6 = vmul.f32 0.03125, %v1011_v4 }
 0x324   : > { %v725_v7 = vsub.f32 %v718_v55, %v724_v3  ;;  %v887_v8 = vsel %vm719_vm2, %v886_v5, 0.0  ;;  %v1192_v55 = vld [vmem:[%s2911_s21 + $0x8] sm:$0xff] }
 0x325   : > { %v1013_v9 = vsub.f32 %v1006_v59, %v1012_v6  ;;  %888 = vadd.xlane.f32.xlu0 %v887_v8  ;;  %v1732_v61 = vpack.c.bf16 %v1192_v55, %v1191_v54 }
 0x326   : > { %v726_v10 = vmul.f32 %v725_v7, %v725_v7 }
 0x327   : > { %v1014_v11 = vmul.f32 %v1013_v9, %v1013_v9 }
 0x328   : > { %v727_v12 = vsel %vm719_vm2, %v726_v10, 0.0 }
 0x329   : > { %728 = vadd.xlane.f32.xlu0 %v727_v12  ;;  %v1015_v13 = vsel %vm719_vm2, %v1014_v11, 0.0  ;;  %v1570_v12 = vld [vmem:[%s2913_s9] ss:$0 sm:$0xff] }
 0x32a   : > { %1016 = vadd.xlane.f32.xlu1 %v1015_v13 }
 0x3b2   : > { %v889_v27 = vpop.xlane.xlu0 %888 }
 0x3b3   : > { %v890_v28 = vmul.f32 0.03125, %v889_v27 }
 0x3b5   : > { %v891_v29 = vadd.f32 1e-05, %v890_v28 }
 0x3b6   : > { %v729_v30 = vpop.xlane.xlu0 %728 }
 0x3b7   : > { %1886 = vrsqrt.f32 %v891_v29  ;;  %v730_v31 = vmul.f32 0.03125, %v729_v30  ;;  %v1017_v32 = vpop.xlane.xlu1 %1016 }
 0x3b8   : > { %v1018_v33 = vmul.f32 0.03125, %v1017_v32 }
 0x3b9   : > { %v731_v34 = vadd.f32 1e-05, %v730_v31 }
 0x3ba   : > { %v1019_v35 = vadd.f32 1e-05, %v1018_v33 }
 0x3bb   : > { %1888 = vrsqrt.f32 %v731_v34 }
 0x3bc   : > { %1890 = vrsqrt.f32 %v1019_v35 }
 0x3c1   : > { %v1887_v36 = vpop.eup %1886 }
 0x3c2   : > { %v893_v38 = vmul.f32 %v1887_v36, %v885_v0  ;;  %v1193_v0 = vld [vmem:[%s2911_s21 + $0x10] sm:$0xff] }
 0x3c3   : > { %v1735_v3 = vpack.c.bf16 %v1194_v1, %v1193_v0 }
 0x3c4   : > { %v901_v39 = vmul.f32 %v1561_v37, %v893_v38 }
 0x3c5   : > { %v1889_v41 = vpop.eup %1888 }
 0x3c6   : > { %v1891_v43 = vpop.eup %1890  ;;  %v733_v44 = vmul.f32 %v1889_v41, %v725_v7  ;;  %v909_v49 = vadd.f32 %v1562_v40, %v901_v39 }
 0x3c7   : > { %v1021_v47 = vmul.f32 %v1891_v43, %v1013_v9  ;;  %v1567_v9 = vld [vmem:[%s2912_s13] ss:$0 sm:$0xff]  ;;  %s2124_s13 = sshll.u32 %s2241_s8, 4  ;;  %s2125_s13 = int_to_ptr.vmem [resolvable:$false] %s2124_s13 }
 0x3c8   : > { %v741_v50 = vmul.f32 %v1556_v42, %v733_v44  ;;  %v916_v59 = vadd.f32 %v1563_v51, %v909_v49  ;;  %s2126_s4 = scalar_lea.vmem %s2125_s13, 256  ;;  %p2127_p11 = scmp.lt.s32.totalorder %s2790_s30, %s2125_s13 }
 0x3c9   : > { %v1022_v52 = vmul.f32 %v1561_v37, %v1021_v47  ;;  %p2128_p5 = scmp.lt.s32.totalorder %s2126_s4, %s2120_s27 }
 0x3ca   : > { %v749_v56 = vadd.f32 %v1557_v48, %v741_v50 }
 0x3cb   : > { %v1023_v60 = vadd.f32 %v1562_v40, %v1022_v52  ;;  %p2129_p7 = por %p2128_p5, %p2127_p11 }
 0x3cc   : > { %1671 = vmatmul.mubr.msk.f32.vlgmr.msra.gmra.mrb[2].mxu1 %vm719_vm2, %v749_v56 }
 0x3cd   : > { %1739 = vmatpush3.bf16.msra.mxu1 %v1738_v53  ;;  %v1024_v62 = vadd.f32 %v1023_v60, %v916_v59  ;;  %1692 = vmatprep.mubr.msk.f32.mxu1 %vm2239_vm0, %v2240_v20  ;;  %p2130_p2 = pnand %p2129_p7, %p2123_p1 }
 0x3ce   : > { %1740 = vmatprep.subr.bf16.mxu1 %v2234_v2 }
 0x3cf   : > { %1660 = vmatmul.mubr.msk.f32.vlgmr.msra.gmra.mrb[2].mxu0 %vm719_vm2, %v1024_v62 }
 0x3d0   : > { %1733 = vmatpush3.bf16.msra.mxu0 %v1732_v61  ;;  %1681 = vmatprep.mubr.msk.f32.mxu0 %vm2239_vm0, %v2240_v20 }
 0x3d1   : > { %1742 = vmatpush3.bf16.msra.mxu1 %v1741_v63  ;;  %1734 = vmatprep.subr.bf16.mxu0 %v2234_v2 }
 0x3d4   : > { %1736 = vmatpush3.bf16.msra.mxu0 %v1735_v3  ;;  %1693 = vmatmul.mubr.msk.f32.vlgmr.msra.gmra.mrb[4].mxu1 %vm719_vm2, %v749_v56 }
 0x3d7   : > { %1682 = vmatmul.mubr.msk.f32.vlgmr.msra.gmra.mrb[4].mxu0 %vm719_vm2, %v1024_v62 }
 0x49f   : > { %v1175_v4 = vpop.f32.mrb[2].mxu1 }
 0x4a0   : > { %v1672_v5 = vpop.f32.mrb[3].mxu1 }
 0x4a2   : > { %v1102_v6 = vpop.f32.mrb[2].mxu0 }
 0x4a3   : > { %v1176_v7 = vadd.f32 %v1175_v4, %v1102_v6  ;;  %v1661_v8 = vpop.f32.mrb[3].mxu0 }
 0x4a5   : > { %v1186_v2 = vadd.f32 %v1567_v9, %v1176_v7 }
 0x4a7   : > { %v1331_v20 = vpop.f32.mrb[4].mxu1  ;;  %v1343_v15 = vmul.f32 %v1186_v2, %v749_v56 }
 0x4a8   : > { %v1694_v10 = vpop.f32.mrb[5].mxu1 }
 0x4aa   : > { %v1261_v11 = vpop.f32.mrb[4].mxu0 }
 0x4ab   : > { %v1332_v13 = vadd.f32 %v1331_v20, %v1261_v11  ;;  %v1683_v14 = vpop.f32.mrb[5].mxu0 }
 0x4ad   : > { %v1342_v16 = vadd.f32 %v1570_v12, %v1332_v13 }
 0x4af   : > { %v1344_v17 = vadd.f32 %v1343_v15, %v1342_v16 }
 0x4b1   : > { %1345 = vst.msk [vmem:[%s710_s22] sm:$0xff] %vm719_vm2, %v1344_v17 }
 0x4b2   : > { %2133 = shalt.err (!%p2130_p2)
}
 0x4b3   : > { %s2134_s10 = scalar_lea.hbm %s2788_s1, 128  ;;  %s2138_s17 = scalar_lea.hbm %s2914_s0, 256 }
 0x4b4   : > { %p2135_p8 = scmp.ne.s32.totalorder %s2788_s1, %s2134_s10  ;;  %p2139_p6 = scmp.lt.u32.totalorder %s2788_s1, %s2914_s0 }
 0x4b5   : > { %p2140_p3 = scmp.lt.u32.totalorder %s2138_s17, %s2134_s10  ;;  %p2142_p0 = scmp.lt.u32.totalorder %s2134_s10, %s2788_s1 }
 0x4b6   : > { %p2136_p9 = pnand %p2135_p8, %p2915_p10 }
 0x4b7   : > { %p2141_p12 = por %p2140_p3, %p2139_p6 }
 0x4b8   : > { %p2137_p4 = pneg %p2136_p9 }
 0x4b9   : > { %p2143_p13 = por %p2142_p0, %p2141_p12 }
 0x4bb   : > { %p2144_p1 = pnand %p2143_p13, %p2137_p4 }
 0x4bd   : > { %2147 = shalt.err (!%p2144_p1)
}
 0x4be   : > { %1771 = dma.vmem_to_hbm [thread:$0]  (%p2915_p10), %s2790_s30, 128, %s2788_s1, %s1347_s6  }
 0x4bf PF: > { %s1373_s3 = sand.u32 1, %s2202_s24   ;;  %p2916_p11 = scmp.ne.s32.totalorder %s2893_s19, 0 }
 0x4c0   : > { %p2917_p5 = scmp.ge.s32.totalorder %s2222_s29, 2  ;;  %s1374_s27 = scalar_lea.sflag [#allocation4], %s1373_s3 }
 0x4c2   : > { %p1800_p7 = pnand %p2917_p5, %p2916_p11 }
 0x4c4   : > { %2197 = dma.done.wait (!%p1800_p7), %s1374_s27, 128  }
 0x4c5   : > { %2199 = vsyncadd (!%p1800_p7), %s1374_s27, 4294967168  ;;  %s39_s29 = sadd.s32 1, %s2222_s29   ;;  %s2918_s24 = smov %s2206_s25 }
 0x4c6   : > { %p36_p2 = scmp.ge.s32.totalorder %s39_s29, 4   ;;  %s2919_s25 = smov %s2210_s26 }
 0x4c7   : > { %s2920_s26 = smov %s2538_s20  ;;  %s2921_s27 = smov %s2218_s28 }
 0x4c8   : > { %s2922_s28 = smov %s2924_s12  ;;  %38 = sbr.rel (!%p36_p2) target bundleno = 27 (0x1b), region = 173 }
 0x4cf   :  { %1379 = vsyncpa [#allocation3], 1 }
 0x4d0   :  { %1381 = vsyncpa [#allocation3 + $0x1], 1 }
 0x4d1   :  { %1382 = vsyncpa [#allocation6], 1 }
 0x4d2   :  { %1384 = vsyncpa [#allocation6 + $0x1], 1 }
 0x4d3   :  { %1385 = vsyncpa [#allocation9], 1 }
 0x4d4   :  { %1386 = vsyncpa [#allocation12], 1 }
 0x4d5   :  { %1387 = vsyncpa [#allocation15], 1 }
 0x4d6   :  { %1388 = vsyncpa [#allocation4], 1 }
 0x4d7   :  { %1390 = vsyncpa [#allocation4 + $0x1], 1 }

</bundles_post_ra>
